<compile_context>
chip_gen: v6e
topology: v6e:2x2x1
jax: 0.10.0
libtpu: 0.0.40
codegen_flags: <defaults>
</compile_context>

<pallas_src>
import jax
import jax.numpy as jnp
import numpy as np
from jax.experimental import pallas as pl
from jax.experimental.pallas import tpu as pltpu  # noqa: F401  (TPU backend)

# ----------------------------- configuration -------------------------------
B = 2          # batch (number of graphs)
N = 8          # number_nodes
NF = 4         # node_features_size
NEIG = 4       # number_eigenvectors
E = 32         # embedding_size
FF = 2         # feedforward_scaling
H = 4          # num_heads
DK = E // H    # per-head dim
L = 2          # num_layers
NC = 3         # num_classes
BN_EPS = 1e-5
NEG = -1e30    # finite "-inf" (NaN-safe)

BHN = B * H * N            # rows of the batched block-diagonal attention (64)
_CHUNK = E // DK           # head rows packed into one concat row (= H)
_GROUPS = N // _CHUNK      # concat rows produced per head (= N // H)
assert E % H == 0 and N % _CHUNK == 0


def _bn(x, gamma, beta):
    """BatchNorm1d, batch stats over axis 0 of the (B*N, E) slab (biased var)."""
    mean = jnp.mean(x, axis=0, keepdims=True)
    xc = x - mean
    var = jnp.mean(xc * xc, axis=0, keepdims=True)
    scale = gamma * jax.lax.rsqrt(var + BN_EPS)     # fold gamma into one scale
    return xc * scale + beta


# ------------------------------ fused kernel --------------------------------
def _graph_transformer_kernel(
    featpe_ref, maskbig_ref,
    rrep_ref, lanemask_ref, sel_ref, nodemask_ref, srow_ref, scol_ref,
    wemb_ref, bemb_ref,
    wq_ref, wk_ref, wv_ref, wotile_ref, bo_ref,
    wf1_ref, bf1_ref, wf2_ref, bf2_ref,
    g1_ref, b1_ref, g2_ref, b2_ref,
    wcls_ref, bcls_ref,
    out_ref,
):
    f32 = jnp.float32

    # ---- fused LaplacianGraphEmbeddings: [feat|pe] @ [Wf;Wp] + (bf+bp) ----
    x0 = jnp.dot(featpe_ref[...], wemb_ref[...],
                 preferred_element_type=f32) + bemb_ref[...]      # (B*N, E)
    x = x0                                                        # residual_connections_1

    rrep = rrep_ref[...]            # (BHN, B*N)  constant replication matrix
    lane_mask = lanemask_ref[...]   # (BHN, E)    per-row head lane-block mask
    mask_big = maskbig_ref[...]     # (BHN, BHN)  additive block-diag adj mask

    for l in range(L):                                            # static unroll
        # ---- batched block-diagonal multihead attention (all b, all h) ----
        x_rep = jnp.dot(rrep, x, preferred_element_type=f32)      # (BHN, E)
        qw = jnp.dot(x_rep, wq_ref[l], preferred_element_type=f32) * lane_mask
        kw = jnp.dot(x_rep, wk_ref[l], preferred_element_type=f32)
        vw = jnp.dot(x_rep, wv_ref[l], preferred_element_type=f32) * lane_mask

        s = jnp.dot(qw, kw.T, preferred_element_type=f32) + mask_big   # (BHN, BHN)
        mrow = jnp.max(s, axis=-1, keepdims=True)
        p = jnp.exp(s - mrow)
        p = p * pl.reciprocal(jnp.sum(p, axis=-1, keepdims=True), approx=False)
        # off-block weights are exactly 0, so this already selects head blocks:
        o = jnp.dot(p, vw, preferred_element_type=f32)            # (BHN, E)

        # ---- output projection with the buggy reshape folded into Wo ----
        # att[b*N+m] = sum_j sel_j @ (o @ Wo_tile[l, j])  (constant matmuls)
        att = jnp.dot(sel_ref[0],
                      jnp.dot(o, wotile_ref[l * _CHUNK + 0],
                              preferred_element_type=f32),
                      preferred_element_type=f32)
        for j in range(1, _CHUNK):
            att = att + jnp.dot(
                sel_ref[j],
                jnp.dot(o, wotile_ref[l * _CHUNK + j], preferred_element_type=f32),
                preferred_element_type=f32)
        att = att + bo_ref[l]

        # dropout1(identity) + batchnorm1(att + res1)
        h1 = _bn(att + x0, g1_ref[l], b1_ref[l])

        # feedforward + dropout2(identity) + batchnorm2(ff + res2)
        ff = jnp.maximum(
            jnp.dot(h1, wf1_ref[l], preferred_element_type=f32) + bf1_ref[l], 0.0)
        ff = jnp.dot(ff, wf2_ref[l], preferred_element_type=f32) + bf2_ref[l]
        x = _bn(ff + h1, g2_ref[l], b2_ref[l])

    # ---- final dropout(identity) + classifier with flatten folded into ----
    # constant matmuls: y = x @ Wcls_blocks, keep own node block, row/col sums.
    y = jnp.dot(x, wcls_ref[...], preferred_element_type=f32) * nodemask_ref[...]
    logits = jnp.dot(jnp.dot(srow_ref[...], y, preferred_element_type=f32),
                     scol_ref[...], preferred_element_type=f32) + bcls_ref[...]
    out_ref[...] = logits                                         # (B, NC)


# ------------------------------ wrapper --------------------------------------
def graph_transformer_forward(packed, node_features, pos_enc, adjacency):
    # fused embedding input
    featpe = jnp.concatenate(
        [node_features.reshape(B * N, NF), pos_enc.reshape(B * N, NEIG)], axis=1)

    # additive attention bias: 0 where adj>0 inside the (graph, head) diagonal
    # block, -1e30 everywhere else (off-block and masked edges).
    bias3 = jnp.where(adjacency > 0.0, 0.0, NEG).astype(jnp.float32)   # (B, N, N)
    groups = jnp.repeat(bias3, H, axis=0)                              # (B*H, N, N)
    same = (jnp.arange(B * H)[:, None, None, None]
            == jnp.arange(B * H)[None, None, :, None])                 # (BH,1,BH,1)
    mask_big = jnp.where(same, groups[:, :, None, :], NEG)
    mask_big = mask_big.reshape(BHN, BHN).astype(jnp.float32)

    return pl.pallas_call(
        _graph_transformer_kernel,
        out_shape=jax.ShapeDtypeStruct((B, NC), jnp.float32),
    )(featpe, mask_big,
      packed["rrep"], packed["lane_mask"], packed["sel"], packed["node_mask"],
      packed["srow"], packed["scol"],
      packed["wemb"], packed["bemb"],
      packed["wq"], packed["wk"], packed["wv"], packed["wotile"], packed["bo"],
      packed["wf1"], packed["bf1"], packed["wf2"], packed["bf2"],
      packed["g1"], packed["b1"], packed["g2"], packed["b2"],
      packed["wcls"], packed["bcls"])


# --------------------------- constant fold matrices --------------------------
def _fold_constants():
    """Constant 0/1 matrices that put replication / reshape / flatten on the MXU."""
    rrep = np.zeros((BHN, B * N), np.float32)        # x -> (b,h,n)-wide replication
    lane_mask = np.zeros((BHN, E), np.float32)       # keep head-h lane block per row
    for b in range(B):
        for h in range(H):
            for n in range(N):
                r = (b * H + h) * N + n
                rrep[r, b * N + n] = 1.0
                lane_mask[r, h * DK:(h + 1) * DK] = 1.0

    # row-selection matrices implementing the buggy (H,N,DK)->(N,E) reshape:
    # dest row m of graph b pulls source row (b*H + m//_GROUPS)*N + (m%_GROUPS)*_CHUNK + j
    sel = np.zeros((_CHUNK, B * N, BHN), np.float32)
    for j in range(_CHUNK):
        for b in range(B):
            for m in range(N):
                h = m // _GROUPS
                g = m % _GROUPS
                r = (b * H + h) * N + g * _CHUNK + j
                sel[j, b * N + m, r] = 1.0

    # classifier flatten helpers
    node_mask = np.zeros((B * N, N * NC), np.float32)   # keep own node's NC block
    srow = np.zeros((B, B * N), np.float32)             # per-graph row sum
    for b in range(B):
        for n in range(N):
            node_mask[b * N + n, n * NC:(n + 1) * NC] = 1.0
            srow[b, b * N + n] = 1.0
    scol = np.zeros((N * NC, NC), np.float32)           # sum node blocks per class
    for n in range(N):
        scol[n * NC:(n + 1) * NC, :] = np.eye(NC, dtype=np.float32)
    return rrep, lane_mask, sel, node_mask, srow, scol


# --------------------------- parameter handling ------------------------------
def init_params(key):
    keys = iter(jax.random.split(key, 32))

    def uni(k, shape, bound):
        return jax.random.uniform(k, shape, jnp.float32, -bound, bound)

    def lin(kw, kb, din, dout):
        bound = 1.0 / (din ** 0.5)
        return uni(kw, (din, dout), bound), uni(kb, (dout,), bound)

    params = {}
    params["wpe"], params["bpe"] = lin(next(keys), next(keys), NEIG, E)
    params["wft"], params["bft"] = lin(next(keys), next(keys), NF, E)

    xav = (6.0 / (E + DK)) ** 0.5   # xavier-uniform bound for head matrices
    layers = []
    for _ in range(L):
        lp = {}
        lp["wq"] = uni(next(keys), (H, E, DK), xav)
        lp["wk"] = uni(next(keys), (H, E, DK), xav)
        lp["wv"] = uni(next(keys), (H, E, DK), xav)
        lp["wo"], lp["bo"] = lin(next(keys), next(keys), E, E)
        lp["wf1"], lp["bf1"] = lin(next(keys), next(keys), E, FF * E)
        lp["wf2"], lp["bf2"] = lin(next(keys), next(keys), FF * E, E)
        lp["g1"] = jnp.ones((E,), jnp.float32)
        lp["b1"] = jnp.zeros((E,), jnp.float32)
        lp["g2"] = jnp.ones((E,), jnp.float32)
        lp["b2"] = jnp.zeros((E,), jnp.float32)
        layers.append(lp)
    params["layers"] = layers
    params["wcls"], params["bcls"] = lin(next(keys), next(keys), N * E, NC)
    return params


def pack_params(params):
    """One-time host-side repack: fold scale / reshape / flatten into weights."""
    def cat_heads(w):                       # (H, E, DK) -> (E, H*DK)
        return jnp.concatenate([w[h] for h in range(H)], axis=1)

    layers = params["layers"]
    inv_scale = 1.0 / (DK ** 0.5)
    rrep, lane_mask, sel, node_mask, srow, scol = _fold_constants()

    # Wo split into DK-row blocks, each tiled H times vertically -> (E, E),
    # so o_wide @ wo_tile picks up exactly the per-row head block's rows of Wo.
    wotile = jnp.stack([
        jnp.tile(lp["wo"][j * DK:(j + 1) * DK, :], (H, 1))
        for lp in layers for j in range(_CHUNK)])                 # (L*_CHUNK, E, E)

    # classifier weight regrouped per node: (N*E, NC) -> (E, N*NC)
    wcls_blocks = params["wcls"].reshape(N, E, NC).transpose(1, 0, 2).reshape(E, N * NC)

    return dict(
        rrep=jnp.asarray(rrep), lane_mask=jnp.asarray(lane_mask),
        sel=jnp.asarray(sel), node_mask=jnp.asarray(node_mask),
        srow=jnp.asarray(srow), scol=jnp.asarray(scol),
        wemb=jnp.concatenate([params["wft"], params["wpe"]], axis=0),   # (NF+NEIG, E)
        bemb=(params["bft"] + params["bpe"]).reshape(1, E),
        wq=jnp.stack([cat_heads(lp["wq"]) * inv_scale for lp in layers]),  # 1/sqrt(dk) folded
        wk=jnp.stack([cat_heads(lp["wk"]) for lp in layers]),
        wv=jnp.stack([cat_heads(lp["wv"]) for lp in layers]),
        wotile=wotile,
        bo=jnp.stack([lp["bo"].reshape(1, E) for lp in layers]),
        wf1=jnp.stack([lp["wf1"] for lp in layers]),
        bf1=jnp.stack([lp["bf1"].reshape(1, FF * E) for lp in layers]),
        wf2=jnp.stack([lp["wf2"] for lp in layers]),
        bf2=jnp.stack([lp["bf2"].reshape(1, E) for lp in layers]),
        g1=jnp.stack([lp["g1"].reshape(1, E) for lp in layers]),
        b1=jnp.stack([lp["b1"].reshape(1, E) for lp in layers]),
        g2=jnp.stack([lp["g2"].reshape(1, E) for lp in layers]),
        b2=jnp.stack([lp["b2"].reshape(1, E) for lp in layers]),
        wcls=wcls_blocks,
        bcls=params["bcls"].reshape(1, NC),
    )


# ----------------------- pure-JAX reference (validation) ---------------------
def reference_forward(params, node_features, pos_enc, adjacency):
    x = (node_features @ params["wft"] + params["bft"]
         + pos_enc @ params["wpe"] + params["bpe"])                    # (B, N, E)
    x0 = x

    def bn(t, gamma, beta):                                            # stats over (B, N)
        flat = t.reshape(B * N, E)
        mean = flat.mean(axis=0)
        var = ((flat - mean) ** 2).mean(axis=0)
        return ((flat - mean) / jnp.sqrt(var + BN_EPS) * gamma + beta).reshape(B, N, E)

    for lp in params["layers"]:
        q = jnp.einsum('bnd,hde->bhne', x, lp["wq"])
        k = jnp.einsum('bnd,hde->bhne', x, lp["wk"])
        v = jnp.einsum('bnd,hde->bhne', x, lp["wv"])
        s = jnp.einsum('bhne,bhme->bhnm', q, k) / (DK ** 0.5)
        s = jnp.where(adjacency[:, None, :, :] > 0, s, NEG)
        w = jax.nn.softmax(s, axis=-1)
        ho = jnp.einsum('bhnm,bhme->bhne', w, v)                       # (B,H,N,DK)
        concat = ho.reshape(B, N, E)                                   # the "buggy" reshape
        att = concat @ lp["wo"] + lp["bo"]
        h1 = bn(att + x0, lp["g1"], lp["b1"])
        ff = jax.nn.relu(h1 @ lp["wf1"] + lp["bf1"]) @ lp["wf2"] + lp["bf2"]
        x = bn(ff + h1, lp["g2"], lp["b2"])
    flat = x.reshape(B, N * E)
    return flat @ params["wcls"] + params["bcls"]


# ---------------------------------- main -------------------------------------
if __name__ == "__main__":
    root = jax.random.PRNGKey(0)
    k_param, k_feat, k_pe, k_adj = jax.random.split(root, 4)

    params = init_params(k_param)
    packed = pack_params(params)            # one-time, outside the jitted forward

    node_features = jax.random.normal(k_feat, (B, N, NF), jnp.float32)
    pos_enc = jax.random.normal(k_pe, (B, N, NEIG), jnp.float32)
    # random 0/1 adjacency with self loops (every softmax row has a valid entry)
    adj = (jax.random.uniform(k_adj, (B, N, N)) > 0.5).astype(jnp.float32)
    adj = jnp.maximum(adj, jnp.eye(N, dtype=jnp.float32)[None, :, :])

    fwd = jax.jit(graph_transformer_forward)
    logits = fwd(packed, node_features, pos_enc, adj)
    jax.block_until_ready(logits)

    assert logits.shape == (B, NC)
    assert bool(jnp.all(jnp.isfinite(logits)))

    ref = reference_forward(params, node_features, pos_enc, adj)
    err = float(jnp.max(jnp.abs(logits - ref)))
    assert err < 1e-2, f"kernel/reference mismatch: max abs err = {err}"
    print("KERNEL_OK")
</pallas_src>

<mosaic_0001>
module attributes {stable_mosaic.version = 11 : i64} {
  func.func @_graph_transformer_kernel(%arg0: memref<16x8xf32, #tpu.memory_space<vmem>>, %arg1: memref<64x64xf32, #tpu.memory_space<vmem>>, %arg2: memref<64x16xf32, #tpu.memory_space<vmem>>, %arg3: memref<64x32xf32, #tpu.memory_space<vmem>>, %arg4: memref<4x16x64xf32, #tpu.memory_space<vmem>>, %arg5: memref<16x24xf32, #tpu.memory_space<vmem>>, %arg6: memref<2x16xf32, #tpu.memory_space<vmem>>, %arg7: memref<24x3xf32, #tpu.memory_space<vmem>>, %arg8: memref<8x32xf32, #tpu.memory_space<vmem>>, %arg9: memref<1x32xf32, #tpu.memory_space<vmem>>, %arg10: memref<2x32x32xf32, #tpu.memory_space<vmem>>, %arg11: memref<2x32x32xf32, #tpu.memory_space<vmem>>, %arg12: memref<2x32x32xf32, #tpu.memory_space<vmem>>, %arg13: memref<8x32x32xf32, #tpu.memory_space<vmem>>, %arg14: memref<2x1x32xf32, #tpu.memory_space<vmem>>, %arg15: memref<2x32x64xf32, #tpu.memory_space<vmem>>, %arg16: memref<2x1x64xf32, #tpu.memory_space<vmem>>, %arg17: memref<2x64x32xf32, #tpu.memory_space<vmem>>, %arg18: memref<2x1x32xf32, #tpu.memory_space<vmem>>, %arg19: memref<2x1x32xf32, #tpu.memory_space<vmem>>, %arg20: memref<2x1x32xf32, #tpu.memory_space<vmem>>, %arg21: memref<2x1x32xf32, #tpu.memory_space<vmem>>, %arg22: memref<2x1x32xf32, #tpu.memory_space<vmem>>, %arg23: memref<32x24xf32, #tpu.memory_space<vmem>>, %arg24: memref<1x3xf32, #tpu.memory_space<vmem>>, %arg25: memref<2x3xf32, #tpu.memory_space<vmem>>) attributes {dimension_semantics = [], scalar_prefetch = 0 : i64, scratch_operands = 0 : i64, tpu.core_type = #tpu.core_type<tc>} {
    %c0 = arith.constant 0 : index
    %c0_0 = arith.constant 0 : index
    %0 = vector.load %arg0[%c0, %c0_0] : memref<16x8xf32, #tpu.memory_space<vmem>>, vector<16x8xf32>
    %c0_1 = arith.constant 0 : index
    %c0_2 = arith.constant 0 : index
    %1 = vector.load %arg8[%c0_1, %c0_2] : memref<8x32xf32, #tpu.memory_space<vmem>>, vector<8x32xf32>
    %cst = arith.constant dense<0.000000e+00> : vector<16x32xf32>
    %2 = tpu.matmul %0, %1, %cst {dimension_numbers = #tpu.dot_dimension_numbers<[1], [0], [0], [1], [0, 0, 1, 1], [], []>} : vector<16x8xf32>, vector<8x32xf32>, vector<16x32xf32> -> vector<16x32xf32>
    %c0_3 = arith.constant 0 : index
    %c0_4 = arith.constant 0 : index
    %3 = vector.load %arg9[%c0_3, %c0_4] : memref<1x32xf32, #tpu.memory_space<vmem>>, vector<1x32xf32>
    %4 = vector.broadcast %3 : vector<1x32xf32> to vector<16x32xf32>
    %5 = arith.addf %2, %4 : vector<16x32xf32>
    %c0_5 = arith.constant 0 : index
    %c0_6 = arith.constant 0 : index
    %6 = vector.load %arg2[%c0_5, %c0_6] : memref<64x16xf32, #tpu.memory_space<vmem>>, vector<64x16xf32>
    %c0_7 = arith.constant 0 : index
    %c0_8 = arith.constant 0 : index
    %7 = vector.load %arg3[%c0_7, %c0_8] : memref<64x32xf32, #tpu.memory_space<vmem>>, vector<64x32xf32>
    %c0_9 = arith.constant 0 : index
    %c0_10 = arith.constant 0 : index
    %8 = vector.load %arg1[%c0_9, %c0_10] : memref<64x64xf32, #tpu.memory_space<vmem>>, vector<64x64xf32>
    %cst_11 = arith.constant dense<0.000000e+00> : vector<64x32xf32>
    %9 = tpu.matmul %6, %5, %cst_11 {dimension_numbers = #tpu.dot_dimension_numbers<[1], [0], [0], [1], [0, 0, 1, 1], [], []>} : vector<64x16xf32>, vector<16x32xf32>, vector<64x32xf32> -> vector<64x32xf32>
    %c0_12 = arith.constant 0 : index
    %c0_13 = arith.constant 0 : index
    %c0_14 = arith.constant 0 : index
    %10 = vector.load %arg10[%c0_12, %c0_13, %c0_14] : memref<2x32x32xf32, #tpu.memory_space<vmem>>, vector<1x32x32xf32>
    %11 = vector.shape_cast %10 : vector<1x32x32xf32> to vector<32x32xf32>
    %cst_15 = arith.constant dense<0.000000e+00> : vector<64x32xf32>
    %12 = tpu.matmul %9, %11, %cst_15 {dimension_numbers = #tpu.dot_dimension_numbers<[1], [0], [0], [1], [0, 0, 1, 1], [], []>} : vector<64x32xf32>, vector<32x32xf32>, vector<64x32xf32> -> vector<64x32xf32>
    %13 = arith.mulf %12, %7 : vector<64x32xf32>
    %c0_16 = arith.constant 0 : index
    %c0_17 = arith.constant 0 : index
    %c0_18 = arith.constant 0 : index
    %14 = vector.load %arg11[%c0_16, %c0_17, %c0_18] : memref<2x32x32xf32, #tpu.memory_space<vmem>>, vector<1x32x32xf32>
    %15 = vector.shape_cast %14 : vector<1x32x32xf32> to vector<32x32xf32>
    %cst_19 = arith.constant dense<0.000000e+00> : vector<64x32xf32>
    %16 = tpu.matmul %9, %15, %cst_19 {dimension_numbers = #tpu.dot_dimension_numbers<[1], [0], [0], [1], [0, 0, 1, 1], [], []>} : vector<64x32xf32>, vector<32x32xf32>, vector<64x32xf32> -> vector<64x32xf32>
    %c0_20 = arith.constant 0 : index
    %c0_21 = arith.constant 0 : index
    %c0_22 = arith.constant 0 : index
    %17 = vector.load %arg12[%c0_20, %c0_21, %c0_22] : memref<2x32x32xf32, #tpu.memory_space<vmem>>, vector<1x32x32xf32>
    %18 = vector.shape_cast %17 : vector<1x32x32xf32> to vector<32x32xf32>
    %cst_23 = arith.constant dense<0.000000e+00> : vector<64x32xf32>
    %19 = tpu.matmul %9, %18, %cst_23 {dimension_numbers = #tpu.dot_dimension_numbers<[1], [0], [0], [1], [0, 0, 1, 1], [], []>} : vector<64x32xf32>, vector<32x32xf32>, vector<64x32xf32> -> vector<64x32xf32>
    %20 = arith.mulf %19, %7 : vector<64x32xf32>
    %21 = tpu.transpose %16, [1, 0] : vector<64x32xf32> -> vector<32x64xf32>
    %cst_24 = arith.constant dense<0.000000e+00> : vector<64x64xf32>
    %22 = tpu.matmul %13, %21, %cst_24 {dimension_numbers = #tpu.dot_dimension_numbers<[1], [0], [0], [1], [0, 0, 1, 1], [], []>} : vector<64x32xf32>, vector<32x64xf32>, vector<64x64xf32> -> vector<64x64xf32>
    %23 = arith.addf %22, %8 : vector<64x64xf32>
    %cst_25 = arith.constant dense<0xFF800000> : vector<64xf32>
    %24 = vector.multi_reduction <maximumf>, %23, %cst_25 [1] : vector<64x64xf32> to vector<64xf32>
    %25 = vector.shape_cast %24 : vector<64xf32> to vector<64x1xf32>
    %26 = vector.broadcast %25 : vector<64x1xf32> to vector<64x64xf32>
    %27 = arith.subf %23, %26 : vector<64x64xf32>
    %28 = math.exp %27 : vector<64x64xf32>
    %cst_26 = arith.constant dense<0.000000e+00> : vector<64xf32>
    %29 = vector.multi_reduction <add>, %28, %cst_26 [1] : vector<64x64xf32> to vector<64xf32>
    %30 = vector.shape_cast %29 : vector<64xf32> to vector<64x1xf32>
    %31 = tpu.reciprocal %30 : vector<64x1xf32> -> vector<64x1xf32>
    %32 = vector.broadcast %31 : vector<64x1xf32> to vector<64x64xf32>
    %33 = arith.mulf %28, %32 : vector<64x64xf32>
    %cst_27 = arith.constant dense<0.000000e+00> : vector<64x32xf32>
    %34 = tpu.matmul %33, %20, %cst_27 {dimension_numbers = #tpu.dot_dimension_numbers<[1], [0], [0], [1], [0, 0, 1, 1], [], []>} : vector<64x64xf32>, vector<64x32xf32>, vector<64x32xf32> -> vector<64x32xf32>
    %c0_28 = arith.constant 0 : index
    %c0_29 = arith.constant 0 : index
    %c0_30 = arith.constant 0 : index
    %35 = vector.load %arg4[%c0_28, %c0_29, %c0_30] : memref<4x16x64xf32, #tpu.memory_space<vmem>>, vector<1x16x64xf32>
    %36 = vector.shape_cast %35 : vector<1x16x64xf32> to vector<16x64xf32>
    %c0_31 = arith.constant 0 : index
    %c0_32 = arith.constant 0 : index
    %c0_33 = arith.constant 0 : index
    %37 = vector.load %arg13[%c0_31, %c0_32, %c0_33] : memref<8x32x32xf32, #tpu.memory_space<vmem>>, vector<1x32x32xf32>
    %38 = vector.shape_cast %37 : vector<1x32x32xf32> to vector<32x32xf32>
    %cst_34 = arith.constant dense<0.000000e+00> : vector<64x32xf32>
    %39 = tpu.matmul %34, %38, %cst_34 {dimension_numbers = #tpu.dot_dimension_numbers<[1], [0], [0], [1], [0, 0, 1, 1], [], []>} : vector<64x32xf32>, vector<32x32xf32>, vector<64x32xf32> -> vector<64x32xf32>
    %cst_35 = arith.constant dense<0.000000e+00> : vector<16x32xf32>
    %40 = tpu.matmul %36, %39, %cst_35 {dimension_numbers = #tpu.dot_dimension_numbers<[1], [0], [0], [1], [0, 0, 1, 1], [], []>} : vector<16x64xf32>, vector<64x32xf32>, vector<16x32xf32> -> vector<16x32xf32>
    %c1 = arith.constant 1 : index
    %c0_36 = arith.constant 0 : index
    %c0_37 = arith.constant 0 : index
    %41 = vector.load %arg4[%c1, %c0_36, %c0_37] : memref<4x16x64xf32, #tpu.memory_space<vmem>>, vector<1x16x64xf32>
    %42 = vector.shape_cast %41 : vector<1x16x64xf32> to vector<16x64xf32>
    %c1_38 = arith.constant 1 : index
    %c0_39 = arith.constant 0 : index
    %c0_40 = arith.constant 0 : index
    %43 = vector.load %arg13[%c1_38, %c0_39, %c0_40] : memref<8x32x32xf32, #tpu.memory_space<vmem>>, vector<1x32x32xf32>
    %44 = vector.shape_cast %43 : vector<1x32x32xf32> to vector<32x32xf32>
    %cst_41 = arith.constant dense<0.000000e+00> : vector<64x32xf32>
    %45 = tpu.matmul %34, %44, %cst_41 {dimension_numbers = #tpu.dot_dimension_numbers<[1], [0], [0], [1], [0, 0, 1, 1], [], []>} : vector<64x32xf32>, vector<32x32xf32>, vector<64x32xf32> -> vector<64x32xf32>
    %cst_42 = arith.constant dense<0.000000e+00> : vector<16x32xf32>
    %46 = tpu.matmul %42, %45, %cst_42 {dimension_numbers = #tpu.dot_dimension_numbers<[1], [0], [0], [1], [0, 0, 1, 1], [], []>} : vector<16x64xf32>, vector<64x32xf32>, vector<16x32xf32> -> vector<16x32xf32>
    %47 = arith.addf %40, %46 : vector<16x32xf32>
    %c2 = arith.constant 2 : index
    %c0_43 = arith.constant 0 : index
    %c0_44 = arith.constant 0 : index
    %48 = vector.load %arg4[%c2, %c0_43, %c0_44] : memref<4x16x64xf32, #tpu.memory_space<vmem>>, vector<1x16x64xf32>
    %49 = vector.shape_cast %48 : vector<1x16x64xf32> to vector<16x64xf32>
    %c2_45 = arith.constant 2 : index
    %c0_46 = arith.constant 0 : index
    %c0_47 = arith.constant 0 : index
    %50 = vector.load %arg13[%c2_45, %c0_46, %c0_47] : memref<8x32x32xf32, #tpu.memory_space<vmem>>, vector<1x32x32xf32>
    %51 = vector.shape_cast %50 : vector<1x32x32xf32> to vector<32x32xf32>
    %cst_48 = arith.constant dense<0.000000e+00> : vector<64x32xf32>
    %52 = tpu.matmul %34, %51, %cst_48 {dimension_numbers = #tpu.dot_dimension_numbers<[1], [0], [0], [1], [0, 0, 1, 1], [], []>} : vector<64x32xf32>, vector<32x32xf32>, vector<64x32xf32> -> vector<64x32xf32>
    %cst_49 = arith.constant dense<0.000000e+00> : vector<16x32xf32>
    %53 = tpu.matmul %49, %52, %cst_49 {dimension_numbers = #tpu.dot_dimension_numbers<[1], [0], [0], [1], [0, 0, 1, 1], [], []>} : vector<16x64xf32>, vector<64x32xf32>, vector<16x32xf32> -> vector<16x32xf32>
    %54 = arith.addf %47, %53 : vector<16x32xf32>
    %c3 = arith.constant 3 : index
    %c0_50 = arith.constant 0 : index
    %c0_51 = arith.constant 0 : index
    %55 = vector.load %arg4[%c3, %c0_50, %c0_51] : memref<4x16x64xf32, #tpu.memory_space<vmem>>, vector<1x16x64xf32>
    %56 = vector.shape_cast %55 : vector<1x16x64xf32> to vector<16x64xf32>
    %c3_52 = arith.constant 3 : index
    %c0_53 = arith.constant 0 : index
    %c0_54 = arith.constant 0 : index
    %57 = vector.load %arg13[%c3_52, %c0_53, %c0_54] : memref<8x32x32xf32, #tpu.memory_space<vmem>>, vector<1x32x32xf32>
    %58 = vector.shape_cast %57 : vector<1x32x32xf32> to vector<32x32xf32>
    %cst_55 = arith.constant dense<0.000000e+00> : vector<64x32xf32>
    %59 = tpu.matmul %34, %58, %cst_55 {dimension_numbers = #tpu.dot_dimension_numbers<[1], [0], [0], [1], [0, 0, 1, 1], [], []>} : vector<64x32xf32>, vector<32x32xf32>, vector<64x32xf32> -> vector<64x32xf32>
    %cst_56 = arith.constant dense<0.000000e+00> : vector<16x32xf32>
    %60 = tpu.matmul %56, %59, %cst_56 {dimension_numbers = #tpu.dot_dimension_numbers<[1], [0], [0], [1], [0, 0, 1, 1], [], []>} : vector<16x64xf32>, vector<64x32xf32>, vector<16x32xf32> -> vector<16x32xf32>
    %61 = arith.addf %54, %60 : vector<16x32xf32>
    %c0_57 = arith.constant 0 : index
    %c0_58 = arith.constant 0 : index
    %c0_59 = arith.constant 0 : index
    %62 = vector.load %arg14[%c0_57, %c0_58, %c0_59] : memref<2x1x32xf32, #tpu.memory_space<vmem>>, vector<1x1x32xf32>
    %63 = vector.shape_cast %62 : vector<1x1x32xf32> to vector<1x32xf32>
    %64 = vector.broadcast %63 : vector<1x32xf32> to vector<16x32xf32>
    %65 = arith.addf %61, %64 : vector<16x32xf32>
    %66 = arith.addf %65, %5 : vector<16x32xf32>
    %c0_60 = arith.constant 0 : index
    %c0_61 = arith.constant 0 : index
    %c0_62 = arith.constant 0 : index
    %67 = vector.load %arg19[%c0_60, %c0_61, %c0_62] : memref<2x1x32xf32, #tpu.memory_space<vmem>>, vector<1x1x32xf32>
    %68 = vector.shape_cast %67 : vector<1x1x32xf32> to vector<1x32xf32>
    %c0_63 = arith.constant 0 : index
    %c0_64 = arith.constant 0 : index
    %c0_65 = arith.constant 0 : index
    %69 = vector.load %arg20[%c0_63, %c0_64, %c0_65] : memref<2x1x32xf32, #tpu.memory_space<vmem>>, vector<1x1x32xf32>
    %70 = vector.shape_cast %69 : vector<1x1x32xf32> to vector<1x32xf32>
    %cst_66 = arith.constant dense<0.000000e+00> : vector<32xf32>
    %71 = vector.multi_reduction <add>, %66, %cst_66 [0] : vector<16x32xf32> to vector<32xf32>
    %72 = vector.shape_cast %71 : vector<32xf32> to vector<1x32xf32>
    %cst_67 = arith.constant 1.600000e+01 : f32
    %73 = vector.broadcast %cst_67 : f32 to vector<1x32xf32>
    %74 = arith.divf %72, %73 : vector<1x32xf32>
    %75 = vector.broadcast %74 : vector<1x32xf32> to vector<16x32xf32>
    %76 = arith.subf %66, %75 : vector<16x32xf32>
    %77 = arith.mulf %76, %76 : vector<16x32xf32>
    %cst_68 = arith.constant dense<0.000000e+00> : vector<32xf32>
    %78 = vector.multi_reduction <add>, %77, %cst_68 [0] : vector<16x32xf32> to vector<32xf32>
    %79 = vector.shape_cast %78 : vector<32xf32> to vector<1x32xf32>
    %cst_69 = arith.constant 1.600000e+01 : f32
    %80 = vector.broadcast %cst_69 : f32 to vector<1x32xf32>
    %81 = arith.divf %79, %80 : vector<1x32xf32>
    %cst_70 = arith.constant 9.99999974E-6 : f32
    %82 = vector.broadcast %cst_70 : f32 to vector<1x32xf32>
    %83 = arith.addf %81, %82 : vector<1x32xf32>
    %84 = math.rsqrt %83 : vector<1x32xf32>
    %85 = arith.mulf %68, %84 : vector<1x32xf32>
    %86 = vector.broadcast %85 : vector<1x32xf32> to vector<16x32xf32>
    %87 = arith.mulf %76, %86 : vector<16x32xf32>
    %88 = vector.broadcast %70 : vector<1x32xf32> to vector<16x32xf32>
    %89 = arith.addf %87, %88 : vector<16x32xf32>
    %c0_71 = arith.constant 0 : index
    %c0_72 = arith.constant 0 : index
    %c0_73 = arith.constant 0 : index
    %90 = vector.load %arg15[%c0_71, %c0_72, %c0_73] : memref<2x32x64xf32, #tpu.memory_space<vmem>>, vector<1x32x64xf32>
    %91 = vector.shape_cast %90 : vector<1x32x64xf32> to vector<32x64xf32>
    %cst_74 = arith.constant dense<0.000000e+00> : vector<16x64xf32>
    %92 = tpu.matmul %89, %91, %cst_74 {dimension_numbers = #tpu.dot_dimension_numbers<[1], [0], [0], [1], [0, 0, 1, 1], [], []>} : vector<16x32xf32>, vector<32x64xf32>, vector<16x64xf32> -> vector<16x64xf32>
    %c0_75 = arith.constant 0 : index
    %c0_76 = arith.constant 0 : index
    %c0_77 = arith.constant 0 : index
    %93 = vector.load %arg16[%c0_75, %c0_76, %c0_77] : memref<2x1x64xf32, #tpu.memory_space<vmem>>, vector<1x1x64xf32>
    %94 = vector.shape_cast %93 : vector<1x1x64xf32> to vector<1x64xf32>
    %95 = vector.broadcast %94 : vector<1x64xf32> to vector<16x64xf32>
    %96 = arith.addf %92, %95 : vector<16x64xf32>
    %cst_78 = arith.constant 0.000000e+00 : f32
    %97 = vector.broadcast %cst_78 : f32 to vector<16x64xf32>
    %98 = arith.maximumf %96, %97 : vector<16x64xf32>
    %c0_79 = arith.constant 0 : index
    %c0_80 = arith.constant 0 : index
    %c0_81 = arith.constant 0 : index
    %99 = vector.load %arg17[%c0_79, %c0_80, %c0_81] : memref<2x64x32xf32, #tpu.memory_space<vmem>>, vector<1x64x32xf32>
    %100 = vector.shape_cast %99 : vector<1x64x32xf32> to vector<64x32xf32>
    %cst_82 = arith.constant dense<0.000000e+00> : vector<16x32xf32>
    %101 = tpu.matmul %98, %100, %cst_82 {dimension_numbers = #tpu.dot_dimension_numbers<[1], [0], [0], [1], [0, 0, 1, 1], [], []>} : vector<16x64xf32>, vector<64x32xf32>, vector<16x32xf32> -> vector<16x32xf32>
    %c0_83 = arith.constant 0 : index
    %c0_84 = arith.constant 0 : index
    %c0_85 = arith.constant 0 : index
    %102 = vector.load %arg18[%c0_83, %c0_84, %c0_85] : memref<2x1x32xf32, #tpu.memory_space<vmem>>, vector<1x1x32xf32>
    %103 = vector.shape_cast %102 : vector<1x1x32xf32> to vector<1x32xf32>
    %104 = vector.broadcast %103 : vector<1x32xf32> to vector<16x32xf32>
    %105 = arith.addf %101, %104 : vector<16x32xf32>
    %106 = arith.addf %105, %89 : vector<16x32xf32>
    %c0_86 = arith.constant 0 : index
    %c0_87 = arith.constant 0 : index
    %c0_88 = arith.constant 0 : index
    %107 = vector.load %arg21[%c0_86, %c0_87, %c0_88] : memref<2x1x32xf32, #tpu.memory_space<vmem>>, vector<1x1x32xf32>
    %108 = vector.shape_cast %107 : vector<1x1x32xf32> to vector<1x32xf32>
    %c0_89 = arith.constant 0 : index
    %c0_90 = arith.constant 0 : index
    %c0_91 = arith.constant 0 : index
    %109 = vector.load %arg22[%c0_89, %c0_90, %c0_91] : memref<2x1x32xf32, #tpu.memory_space<vmem>>, vector<1x1x32xf32>
    %110 = vector.shape_cast %109 : vector<1x1x32xf32> to vector<1x32xf32>
    %cst_92 = arith.constant dense<0.000000e+00> : vector<32xf32>
    %111 = vector.multi_reduction <add>, %106, %cst_92 [0] : vector<16x32xf32> to vector<32xf32>
    %112 = vector.shape_cast %111 : vector<32xf32> to vector<1x32xf32>
    %cst_93 = arith.constant 1.600000e+01 : f32
    %113 = vector.broadcast %cst_93 : f32 to vector<1x32xf32>
    %114 = arith.divf %112, %113 : vector<1x32xf32>
    %115 = vector.broadcast %114 : vector<1x32xf32> to vector<16x32xf32>
    %116 = arith.subf %106, %115 : vector<16x32xf32>
    %117 = arith.mulf %116, %116 : vector<16x32xf32>
    %cst_94 = arith.constant dense<0.000000e+00> : vector<32xf32>
    %118 = vector.multi_reduction <add>, %117, %cst_94 [0] : vector<16x32xf32> to vector<32xf32>
    %119 = vector.shape_cast %118 : vector<32xf32> to vector<1x32xf32>
    %cst_95 = arith.constant 1.600000e+01 : f32
    %120 = vector.broadcast %cst_95 : f32 to vector<1x32xf32>
    %121 = arith.divf %119, %120 : vector<1x32xf32>
    %cst_96 = arith.constant 9.99999974E-6 : f32
    %122 = vector.broadcast %cst_96 : f32 to vector<1x32xf32>
    %123 = arith.addf %121, %122 : vector<1x32xf32>
    %124 = math.rsqrt %123 : vector<1x32xf32>
    %125 = arith.mulf %108, %124 : vector<1x32xf32>
    %126 = vector.broadcast %125 : vector<1x32xf32> to vector<16x32xf32>
    %127 = arith.mulf %116, %126 : vector<16x32xf32>
    %128 = vector.broadcast %110 : vector<1x32xf32> to vector<16x32xf32>
    %129 = arith.addf %127, %128 : vector<16x32xf32>
    %cst_97 = arith.constant dense<0.000000e+00> : vector<64x32xf32>
    %130 = tpu.matmul %6, %129, %cst_97 {dimension_numbers = #tpu.dot_dimension_numbers<[1], [0], [0], [1], [0, 0, 1, 1], [], []>} : vector<64x16xf32>, vector<16x32xf32>, vector<64x32xf32> -> vector<64x32xf32>
    %c1_98 = arith.constant 1 : index
    %c0_99 = arith.constant 0 : index
    %c0_100 = arith.constant 0 : index
    %131 = vector.load %arg10[%c1_98, %c0_99, %c0_100] : memref<2x32x32xf32, #tpu.memory_space<vmem>>, vector<1x32x32xf32>
    %132 = vector.shape_cast %131 : vector<1x32x32xf32> to vector<32x32xf32>
    %cst_101 = arith.constant dense<0.000000e+00> : vector<64x32xf32>
    %133 = tpu.matmul %130, %132, %cst_101 {dimension_numbers = #tpu.dot_dimension_numbers<[1], [0], [0], [1], [0, 0, 1, 1], [], []>} : vector<64x32xf32>, vector<32x32xf32>, vector<64x32xf32> -> vector<64x32xf32>
    %134 = arith.mulf %133, %7 : vector<64x32xf32>
    %c1_102 = arith.constant 1 : index
    %c0_103 = arith.constant 0 : index
    %c0_104 = arith.constant 0 : index
    %135 = vector.load %arg11[%c1_102, %c0_103, %c0_104] : memref<2x32x32xf32, #tpu.memory_space<vmem>>, vector<1x32x32xf32>
    %136 = vector.shape_cast %135 : vector<1x32x32xf32> to vector<32x32xf32>
    %cst_105 = arith.constant dense<0.000000e+00> : vector<64x32xf32>
    %137 = tpu.matmul %130, %136, %cst_105 {dimension_numbers = #tpu.dot_dimension_numbers<[1], [0], [0], [1], [0, 0, 1, 1], [], []>} : vector<64x32xf32>, vector<32x32xf32>, vector<64x32xf32> -> vector<64x32xf32>
    %c1_106 = arith.constant 1 : index
    %c0_107 = arith.constant 0 : index
    %c0_108 = arith.constant 0 : index
    %138 = vector.load %arg12[%c1_106, %c0_107, %c0_108] : memref<2x32x32xf32, #tpu.memory_space<vmem>>, vector<1x32x32xf32>
    %139 = vector.shape_cast %138 : vector<1x32x32xf32> to vector<32x32xf32>
    %cst_109 = arith.constant dense<0.000000e+00> : vector<64x32xf32>
    %140 = tpu.matmul %130, %139, %cst_109 {dimension_numbers = #tpu.dot_dimension_numbers<[1], [0], [0], [1], [0, 0, 1, 1], [], []>} : vector<64x32xf32>, vector<32x32xf32>, vector<64x32xf32> -> vector<64x32xf32>
    %141 = arith.mulf %140, %7 : vector<64x32xf32>
    %142 = tpu.transpose %137, [1, 0] : vector<64x32xf32> -> vector<32x64xf32>
    %cst_110 = arith.constant dense<0.000000e+00> : vector<64x64xf32>
    %143 = tpu.matmul %134, %142, %cst_110 {dimension_numbers = #tpu.dot_dimension_numbers<[1], [0], [0], [1], [0, 0, 1, 1], [], []>} : vector<64x32xf32>, vector<32x64xf32>, vector<64x64xf32> -> vector<64x64xf32>
    %144 = arith.addf %143, %8 : vector<64x64xf32>
    %cst_111 = arith.constant dense<0xFF800000> : vector<64xf32>
    %145 = vector.multi_reduction <maximumf>, %144, %cst_111 [1] : vector<64x64xf32> to vector<64xf32>
    %146 = vector.shape_cast %145 : vector<64xf32> to vector<64x1xf32>
    %147 = vector.broadcast %146 : vector<64x1xf32> to vector<64x64xf32>
    %148 = arith.subf %144, %147 : vector<64x64xf32>
    %149 = math.exp %148 : vector<64x64xf32>
    %cst_112 = arith.constant dense<0.000000e+00> : vector<64xf32>
    %150 = vector.multi_reduction <add>, %149, %cst_112 [1] : vector<64x64xf32> to vector<64xf32>
    %151 = vector.shape_cast %150 : vector<64xf32> to vector<64x1xf32>
    %152 = tpu.reciprocal %151 : vector<64x1xf32> -> vector<64x1xf32>
    %153 = vector.broadcast %152 : vector<64x1xf32> to vector<64x64xf32>
    %154 = arith.mulf %149, %153 : vector<64x64xf32>
    %cst_113 = arith.constant dense<0.000000e+00> : vector<64x32xf32>
    %155 = tpu.matmul %154, %141, %cst_113 {dimension_numbers = #tpu.dot_dimension_numbers<[1], [0], [0], [1], [0, 0, 1, 1], [], []>} : vector<64x64xf32>, vector<64x32xf32>, vector<64x32xf32> -> vector<64x32xf32>
    %c0_114 = arith.constant 0 : index
    %c0_115 = arith.constant 0 : index
    %c0_116 = arith.constant 0 : index
    %156 = vector.load %arg4[%c0_114, %c0_115, %c0_116] : memref<4x16x64xf32, #tpu.memory_space<vmem>>, vector<1x16x64xf32>
    %157 = vector.shape_cast %156 : vector<1x16x64xf32> to vector<16x64xf32>
    %c4 = arith.constant 4 : index
    %c0_117 = arith.constant 0 : index
    %c0_118 = arith.constant 0 : index
    %158 = vector.load %arg13[%c4, %c0_117, %c0_118] : memref<8x32x32xf32, #tpu.memory_space<vmem>>, vector<1x32x32xf32>
    %159 = vector.shape_cast %158 : vector<1x32x32xf32> to vector<32x32xf32>
    %cst_119 = arith.constant dense<0.000000e+00> : vector<64x32xf32>
    %160 = tpu.matmul %155, %159, %cst_119 {dimension_numbers = #tpu.dot_dimension_numbers<[1], [0], [0], [1], [0, 0, 1, 1], [], []>} : vector<64x32xf32>, vector<32x32xf32>, vector<64x32xf32> -> vector<64x32xf32>
    %cst_120 = arith.constant dense<0.000000e+00> : vector<16x32xf32>
    %161 = tpu.matmul %157, %160, %cst_120 {dimension_numbers = #tpu.dot_dimension_numbers<[1], [0], [0], [1], [0, 0, 1, 1], [], []>} : vector<16x64xf32>, vector<64x32xf32>, vector<16x32xf32> -> vector<16x32xf32>
    %c1_121 = arith.constant 1 : index
    %c0_122 = arith.constant 0 : index
    %c0_123 = arith.constant 0 : index
    %162 = vector.load %arg4[%c1_121, %c0_122, %c0_123] : memref<4x16x64xf32, #tpu.memory_space<vmem>>, vector<1x16x64xf32>
    %163 = vector.shape_cast %162 : vector<1x16x64xf32> to vector<16x64xf32>
    %c5 = arith.constant 5 : index
    %c0_124 = arith.constant 0 : index
    %c0_125 = arith.constant 0 : index
    %164 = vector.load %arg13[%c5, %c0_124, %c0_125] : memref<8x32x32xf32, #tpu.memory_space<vmem>>, vector<1x32x32xf32>
    %165 = vector.shape_cast %164 : vector<1x32x32xf32> to vector<32x32xf32>
    %cst_126 = arith.constant dense<0.000000e+00> : vector<64x32xf32>
    %166 = tpu.matmul %155, %165, %cst_126 {dimension_numbers = #tpu.dot_dimension_numbers<[1], [0], [0], [1], [0, 0, 1, 1], [], []>} : vector<64x32xf32>, vector<32x32xf32>, vector<64x32xf32> -> vector<64x32xf32>
    %cst_127 = arith.constant dense<0.000000e+00> : vector<16x32xf32>
    %167 = tpu.matmul %163, %166, %cst_127 {dimension_numbers = #tpu.dot_dimension_numbers<[1], [0], [0], [1], [0, 0, 1, 1], [], []>} : vector<16x64xf32>, vector<64x32xf32>, vector<16x32xf32> -> vector<16x32xf32>
    %168 = arith.addf %161, %167 : vector<16x32xf32>
    %c2_128 = arith.constant 2 : index
    %c0_129 = arith.constant 0 : index
    %c0_130 = arith.constant 0 : index
    %169 = vector.load %arg4[%c2_128, %c0_129, %c0_130] : memref<4x16x64xf32, #tpu.memory_space<vmem>>, vector<1x16x64xf32>
    %170 = vector.shape_cast %169 : vector<1x16x64xf32> to vector<16x64xf32>
    %c6 = arith.constant 6 : index
    %c0_131 = arith.constant 0 : index
    %c0_132 = arith.constant 0 : index
    %171 = vector.load %arg13[%c6, %c0_131, %c0_132] : memref<8x32x32xf32, #tpu.memory_space<vmem>>, vector<1x32x32xf32>
    %172 = vector.shape_cast %171 : vector<1x32x32xf32> to vector<32x32xf32>
    %cst_133 = arith.constant dense<0.000000e+00> : vector<64x32xf32>
    %173 = tpu.matmul %155, %172, %cst_133 {dimension_numbers = #tpu.dot_dimension_numbers<[1], [0], [0], [1], [0, 0, 1, 1], [], []>} : vector<64x32xf32>, vector<32x32xf32>, vector<64x32xf32> -> vector<64x32xf32>
    %cst_134 = arith.constant dense<0.000000e+00> : vector<16x32xf32>
    %174 = tpu.matmul %170, %173, %cst_134 {dimension_numbers = #tpu.dot_dimension_numbers<[1], [0], [0], [1], [0, 0, 1, 1], [], []>} : vector<16x64xf32>, vector<64x32xf32>, vector<16x32xf32> -> vector<16x32xf32>
    %175 = arith.addf %168, %174 : vector<16x32xf32>
    %c3_135 = arith.constant 3 : index
    %c0_136 = arith.constant 0 : index
    %c0_137 = arith.constant 0 : index
    %176 = vector.load %arg4[%c3_135, %c0_136, %c0_137] : memref<4x16x64xf32, #tpu.memory_space<vmem>>, vector<1x16x64xf32>
    %177 = vector.shape_cast %176 : vector<1x16x64xf32> to vector<16x64xf32>
    %c7 = arith.constant 7 : index
    %c0_138 = arith.constant 0 : index
    %c0_139 = arith.constant 0 : index
    %178 = vector.load %arg13[%c7, %c0_138, %c0_139] : memref<8x32x32xf32, #tpu.memory_space<vmem>>, vector<1x32x32xf32>
    %179 = vector.shape_cast %178 : vector<1x32x32xf32> to vector<32x32xf32>
    %cst_140 = arith.constant dense<0.000000e+00> : vector<64x32xf32>
    %180 = tpu.matmul %155, %179, %cst_140 {dimension_numbers = #tpu.dot_dimension_numbers<[1], [0], [0], [1], [0, 0, 1, 1], [], []>} : vector<64x32xf32>, vector<32x32xf32>, vector<64x32xf32> -> vector<64x32xf32>
    %cst_141 = arith.constant dense<0.000000e+00> : vector<16x32xf32>
    %181 = tpu.matmul %177, %180, %cst_141 {dimension_numbers = #tpu.dot_dimension_numbers<[1], [0], [0], [1], [0, 0, 1, 1], [], []>} : vector<16x64xf32>, vector<64x32xf32>, vector<16x32xf32> -> vector<16x32xf32>
    %182 = arith.addf %175, %181 : vector<16x32xf32>
    %c1_142 = arith.constant 1 : index
    %c0_143 = arith.constant 0 : index
    %c0_144 = arith.constant 0 : index
    %183 = vector.load %arg14[%c1_142, %c0_143, %c0_144] : memref<2x1x32xf32, #tpu.memory_space<vmem>>, vector<1x1x32xf32>
    %184 = vector.shape_cast %183 : vector<1x1x32xf32> to vector<1x32xf32>
    %185 = vector.broadcast %184 : vector<1x32xf32> to vector<16x32xf32>
    %186 = arith.addf %182, %185 : vector<16x32xf32>
    %187 = arith.addf %186, %5 : vector<16x32xf32>
    %c1_145 = arith.constant 1 : index
    %c0_146 = arith.constant 0 : index
    %c0_147 = arith.constant 0 : index
    %188 = vector.load %arg19[%c1_145, %c0_146, %c0_147] : memref<2x1x32xf32, #tpu.memory_space<vmem>>, vector<1x1x32xf32>
    %189 = vector.shape_cast %188 : vector<1x1x32xf32> to vector<1x32xf32>
    %c1_148 = arith.constant 1 : index
    %c0_149 = arith.constant 0 : index
    %c0_150 = arith.constant 0 : index
    %190 = vector.load %arg20[%c1_148, %c0_149, %c0_150] : memref<2x1x32xf32, #tpu.memory_space<vmem>>, vector<1x1x32xf32>
    %191 = vector.shape_cast %190 : vector<1x1x32xf32> to vector<1x32xf32>
    %cst_151 = arith.constant dense<0.000000e+00> : vector<32xf32>
    %192 = vector.multi_reduction <add>, %187, %cst_151 [0] : vector<16x32xf32> to vector<32xf32>
    %193 = vector.shape_cast %192 : vector<32xf32> to vector<1x32xf32>
    %cst_152 = arith.constant 1.600000e+01 : f32
    %194 = vector.broadcast %cst_152 : f32 to vector<1x32xf32>
    %195 = arith.divf %193, %194 : vector<1x32xf32>
    %196 = vector.broadcast %195 : vector<1x32xf32> to vector<16x32xf32>
    %197 = arith.subf %187, %196 : vector<16x32xf32>
    %198 = arith.mulf %197, %197 : vector<16x32xf32>
    %cst_153 = arith.constant dense<0.000000e+00> : vector<32xf32>
    %199 = vector.multi_reduction <add>, %198, %cst_153 [0] : vector<16x32xf32> to vector<32xf32>
    %200 = vector.shape_cast %199 : vector<32xf32> to vector<1x32xf32>
    %cst_154 = arith.constant 1.600000e+01 : f32
    %201 = vector.broadcast %cst_154 : f32 to vector<1x32xf32>
    %202 = arith.divf %200, %201 : vector<1x32xf32>
    %cst_155 = arith.constant 9.99999974E-6 : f32
    %203 = vector.broadcast %cst_155 : f32 to vector<1x32xf32>
    %204 = arith.addf %202, %203 : vector<1x32xf32>
    %205 = math.rsqrt %204 : vector<1x32xf32>
    %206 = arith.mulf %189, %205 : vector<1x32xf32>
    %207 = vector.broadcast %206 : vector<1x32xf32> to vector<16x32xf32>
    %208 = arith.mulf %197, %207 : vector<16x32xf32>
    %209 = vector.broadcast %191 : vector<1x32xf32> to vector<16x32xf32>
    %210 = arith.addf %208, %209 : vector<16x32xf32>
    %c1_156 = arith.constant 1 : index
    %c0_157 = arith.constant 0 : index
    %c0_158 = arith.constant 0 : index
    %211 = vector.load %arg15[%c1_156, %c0_157, %c0_158] : memref<2x32x64xf32, #tpu.memory_space<vmem>>, vector<1x32x64xf32>
    %212 = vector.shape_cast %211 : vector<1x32x64xf32> to vector<32x64xf32>
    %cst_159 = arith.constant dense<0.000000e+00> : vector<16x64xf32>
    %213 = tpu.matmul %210, %212, %cst_159 {dimension_numbers = #tpu.dot_dimension_numbers<[1], [0], [0], [1], [0, 0, 1, 1], [], []>} : vector<16x32xf32>, vector<32x64xf32>, vector<16x64xf32> -> vector<16x64xf32>
    %c1_160 = arith.constant 1 : index
    %c0_161 = arith.constant 0 : index
    %c0_162 = arith.constant 0 : index
    %214 = vector.load %arg16[%c1_160, %c0_161, %c0_162] : memref<2x1x64xf32, #tpu.memory_space<vmem>>, vector<1x1x64xf32>
    %215 = vector.shape_cast %214 : vector<1x1x64xf32> to vector<1x64xf32>
    %216 = vector.broadcast %215 : vector<1x64xf32> to vector<16x64xf32>
    %217 = arith.addf %213, %216 : vector<16x64xf32>
    %cst_163 = arith.constant 0.000000e+00 : f32
    %218 = vector.broadcast %cst_163 : f32 to vector<16x64xf32>
    %219 = arith.maximumf %217, %218 : vector<16x64xf32>
    %c1_164 = arith.constant 1 : index
    %c0_165 = arith.constant 0 : index
    %c0_166 = arith.constant 0 : index
    %220 = vector.load %arg17[%c1_164, %c0_165, %c0_166] : memref<2x64x32xf32, #tpu.memory_space<vmem>>, vector<1x64x32xf32>
    %221 = vector.shape_cast %220 : vector<1x64x32xf32> to vector<64x32xf32>
    %cst_167 = arith.constant dense<0.000000e+00> : vector<16x32xf32>
    %222 = tpu.matmul %219, %221, %cst_167 {dimension_numbers = #tpu.dot_dimension_numbers<[1], [0], [0], [1], [0, 0, 1, 1], [], []>} : vector<16x64xf32>, vector<64x32xf32>, vector<16x32xf32> -> vector<16x32xf32>
    %c1_168 = arith.constant 1 : index
    %c0_169 = arith.constant 0 : index
    %c0_170 = arith.constant 0 : index
    %223 = vector.load %arg18[%c1_168, %c0_169, %c0_170] : memref<2x1x32xf32, #tpu.memory_space<vmem>>, vector<1x1x32xf32>
    %224 = vector.shape_cast %223 : vector<1x1x32xf32> to vector<1x32xf32>
    %225 = vector.broadcast %224 : vector<1x32xf32> to vector<16x32xf32>
    %226 = arith.addf %222, %225 : vector<16x32xf32>
    %227 = arith.addf %226, %210 : vector<16x32xf32>
    %c1_171 = arith.constant 1 : index
    %c0_172 = arith.constant 0 : index
    %c0_173 = arith.constant 0 : index
    %228 = vector.load %arg21[%c1_171, %c0_172, %c0_173] : memref<2x1x32xf32, #tpu.memory_space<vmem>>, vector<1x1x32xf32>
    %229 = vector.shape_cast %228 : vector<1x1x32xf32> to vector<1x32xf32>
    %c1_174 = arith.constant 1 : index
    %c0_175 = arith.constant 0 : index
    %c0_176 = arith.constant 0 : index
    %230 = vector.load %arg22[%c1_174, %c0_175, %c0_176] : memref<2x1x32xf32, #tpu.memory_space<vmem>>, vector<1x1x32xf32>
    %231 = vector.shape_cast %230 : vector<1x1x32xf32> to vector<1x32xf32>
    %cst_177 = arith.constant dense<0.000000e+00> : vector<32xf32>
    %232 = vector.multi_reduction <add>, %227, %cst_177 [0] : vector<16x32xf32> to vector<32xf32>
    %233 = vector.shape_cast %232 : vector<32xf32> to vector<1x32xf32>
    %cst_178 = arith.constant 1.600000e+01 : f32
    %234 = vector.broadcast %cst_178 : f32 to vector<1x32xf32>
    %235 = arith.divf %233, %234 : vector<1x32xf32>
    %236 = vector.broadcast %235 : vector<1x32xf32> to vector<16x32xf32>
    %237 = arith.subf %227, %236 : vector<16x32xf32>
    %238 = arith.mulf %237, %237 : vector<16x32xf32>
    %cst_179 = arith.constant dense<0.000000e+00> : vector<32xf32>
    %239 = vector.multi_reduction <add>, %238, %cst_179 [0] : vector<16x32xf32> to vector<32xf32>
    %240 = vector.shape_cast %239 : vector<32xf32> to vector<1x32xf32>
    %cst_180 = arith.constant 1.600000e+01 : f32
    %241 = vector.broadcast %cst_180 : f32 to vector<1x32xf32>
    %242 = arith.divf %240, %241 : vector<1x32xf32>
    %cst_181 = arith.constant 9.99999974E-6 : f32
    %243 = vector.broadcast %cst_181 : f32 to vector<1x32xf32>
    %244 = arith.addf %242, %243 : vector<1x32xf32>
    %245 = math.rsqrt %244 : vector<1x32xf32>
    %246 = arith.mulf %229, %245 : vector<1x32xf32>
    %247 = vector.broadcast %246 : vector<1x32xf32> to vector<16x32xf32>
    %248 = arith.mulf %237, %247 : vector<16x32xf32>
    %249 = vector.broadcast %231 : vector<1x32xf32> to vector<16x32xf32>
    %250 = arith.addf %248, %249 : vector<16x32xf32>
    %c0_182 = arith.constant 0 : index
    %c0_183 = arith.constant 0 : index
    %251 = vector.load %arg23[%c0_182, %c0_183] : memref<32x24xf32, #tpu.memory_space<vmem>>, vector<32x24xf32>
    %cst_184 = arith.constant dense<0.000000e+00> : vector<16x24xf32>
    %252 = tpu.matmul %250, %251, %cst_184 {dimension_numbers = #tpu.dot_dimension_numbers<[1], [0], [0], [1], [0, 0, 1, 1], [], []>} : vector<16x32xf32>, vector<32x24xf32>, vector<16x24xf32> -> vector<16x24xf32>
    %c0_185 = arith.constant 0 : index
    %c0_186 = arith.constant 0 : index
    %253 = vector.load %arg5[%c0_185, %c0_186] : memref<16x24xf32, #tpu.memory_space<vmem>>, vector<16x24xf32>
    %254 = arith.mulf %252, %253 : vector<16x24xf32>
    %c0_187 = arith.constant 0 : index
    %c0_188 = arith.constant 0 : index
    %255 = vector.load %arg6[%c0_187, %c0_188] : memref<2x16xf32, #tpu.memory_space<vmem>>, vector<2x16xf32>
    %cst_189 = arith.constant dense<0.000000e+00> : vector<2x24xf32>
    %256 = tpu.matmul %255, %254, %cst_189 {dimension_numbers = #tpu.dot_dimension_numbers<[1], [0], [0], [1], [0, 0, 1, 1], [], []>} : vector<2x16xf32>, vector<16x24xf32>, vector<2x24xf32> -> vector<2x24xf32>
    %c0_190 = arith.constant 0 : index
    %c0_191 = arith.constant 0 : index
    %257 = vector.load %arg7[%c0_190, %c0_191] : memref<24x3xf32, #tpu.memory_space<vmem>>, vector<24x3xf32>
    %cst_192 = arith.constant dense<0.000000e+00> : vector<2x3xf32>
    %258 = tpu.matmul %256, %257, %cst_192 {dimension_numbers = #tpu.dot_dimension_numbers<[1], [0], [0], [1], [0, 0, 1, 1], [], []>} : vector<2x24xf32>, vector<24x3xf32>, vector<2x3xf32> -> vector<2x3xf32>
    %c0_193 = arith.constant 0 : index
    %c0_194 = arith.constant 0 : index
    %259 = vector.load %arg24[%c0_193, %c0_194] : memref<1x3xf32, #tpu.memory_space<vmem>>, vector<1x3xf32>
    %260 = vector.broadcast %259 : vector<1x3xf32> to vector<2x3xf32>
    %261 = arith.addf %258, %260 : vector<2x3xf32>
    %c0_195 = arith.constant 0 : index
    %c0_196 = arith.constant 0 : index
    %262 = vector.load %arg25[%c0_195, %c0_196] : memref<2x3xf32, #tpu.memory_space<vmem>>, vector<2x3xf32>
    tpu.vector_store %arg25[%c0_195, %c0_196], %261 {strides = array<i32>} : memref<2x3xf32, #tpu.memory_space<vmem>>, vector<2x3xf32>,
    return
  }
}

</mosaic_0001>

<bundles_post_ra>
// kernel: graph_transformer_forward.1
= control target key start
LH: loop header
LB: loop body
LE: loop exit
PB: predicated region body
PF: predicated region fallthrough
CT: control target
= control target key end

     0   :  { %s6906_s0 = inlined_call_operand.vmem [shape: f32[16,8], index: 0, kind: input, shape index: {}]   ;;  %s6907_s1 = inlined_call_operand.vmem [shape: f32[64,64], index: 1, kind: input, shape index: {}]   ;;  %s6908_s2 = inlined_call_operand.vmem [shape: f32[64,16], index: 2, kind: input, shape index: {}]   ;;  %s6909_s3 = inlined_call_operand.vmem [shape: f32[64,32], index: 3, kind: input, shape index: {}]   ;;  %s6910_s4 = inlined_call_operand.vmem [shape: f32[4,16,64], index: 4, kind: input, shape index: {}]   ;;  %s6911_s5 = inlined_call_operand.vmem [shape: f32[16,24], index: 5, kind: input, shape index: {}]   ;;  %s6912_s6 = inlined_call_operand.vmem [shape: f32[2,16], index: 6, kind: input, shape index: {}]   ;;  %s6913_s7 = inlined_call_operand.vmem [shape: f32[24,3], index: 7, kind: input, shape index: {}]   ;;  %s6914_s8 = inlined_call_operand.vmem [shape: f32[8,32], index: 8, kind: input, shape index: {}]   ;;  %s6915_s9 = inlined_call_operand.vmem [shape: f32[1,32], index: 9, kind: input, shape index: {}]   ;;  %s6916_s10 = inlined_call_operand.vmem [shape: f32[2,32,32], index: 10, kind: input, shape index: {}]   ;;  %s6917_s11 = inlined_call_operand.vmem [shape: f32[2,32,32], index: 11, kind: input, shape index: {}]   ;;  %s6918_s12 = inlined_call_operand.vmem [shape: f32[2,32,32], index: 12, kind: input, shape index: {}]   ;;  %s6919_s13 = inlined_call_operand.vmem [shape: f32[8,32,32], index: 13, kind: input, shape index: {}]   ;;  %s6920_s14 = inlined_call_operand.vmem [shape: f32[2,1,32], index: 14, kind: input, shape index: {}]   ;;  %s6921_s15 = inlined_call_operand.vmem [shape: f32[2,32,64], index: 15, kind: input, shape index: {}]   ;;  %s6922_s16 = inlined_call_operand.vmem [shape: f32[2,1,64], index: 16, kind: input, shape index: {}]   ;;  %s6923_s17 = inlined_call_operand.vmem [shape: f32[2,64,32], index: 17, kind: input, shape index: {}]   ;;  %s6924_s18 = inlined_call_operand.vmem [shape: f32[2,1,32], index: 18, kind: input, shape index: {}]   ;;  %s6925_s19 = inlined_call_operand.vmem [shape: f32[2,1,32], index: 19, kind: input, shape index: {}]   ;;  %s6926_s20 = inlined_call_operand.vmem [shape: f32[2,1,32], index: 20, kind: input, shape index: {}]   ;;  %s6927_s21 = inlined_call_operand.vmem [shape: f32[2,1,32], index: 21, kind: input, shape index: {}]   ;;  %s6928_s22 = inlined_call_operand.vmem [shape: f32[2,1,32], index: 22, kind: input, shape index: {}]   ;;  %s6929_s23 = inlined_call_operand.vmem [shape: f32[32,24], index: 23, kind: input, shape index: {}]   ;;  %s6930_s24 = inlined_call_operand.vmem [shape: f32[1,3], index: 24, kind: input, shape index: {}]   ;;  %s6931_s25 = inlined_call_operand.hbm [shape: f32[2,3], index: 25, kind: output, shape index: {}]  }
   0x1   :  { %6940 = sst [smem:[#allocation5_spill]] %s6906_s0 }
   0x2   :  { %6941 = sst [smem:[#allocation6_spill]] %s6907_s1 }
   0x3   :  { %6942 = sst [smem:[#allocation7_spill]] %s6908_s2 }
   0x4   :  { %6943 = sst [smem:[#allocation8_spill]] %s6909_s3 }
   0x5   :  { %6944 = sst [smem:[#allocation9_spill]] %s6910_s4 }
   0x6   :  { %6945 = sst [smem:[#allocation10_spill]] %s6911_s5 }
   0x7   :  { %6946 = sst [smem:[#allocation11_spill]] %s6912_s6 }
   0x8   :  { %6947 = sst [smem:[#allocation12_spill]] %s6913_s7 }
   0x9   :  { %6948 = sst [smem:[#allocation13_spill]] %s6914_s8 }
   0xa   :  { %6949 = sst [smem:[#allocation14_spill]] %s6915_s9 }
   0xb   :  { %6950 = sst [smem:[#allocation15_spill]] %s6924_s18 }
   0xc   :  { %s6951_s6 = sld [smem:[#allocation13_spill]]  ;;  %vm91_vm0 = vcmask 64512  }
   0xd   :  { %s6952_s18 = sld [smem:[#allocation5_spill]] }
  0x12   :  { %v83_v0 = vld [vmem:[%s6951_s6] sm:$0xff] }
  0x13   :  { %v81_v1 = vld [vmem:[%s6952_s18] sm:$0xff]  ;;  %v82_v2 = vld [vmem:[%s6952_s18 + $0x8] sm:$0xff]  ;;  %5003 = vmatprep.subr.mxu1 %v83_v0 }
  0x14   :  { %5005 = vmatprep.mubr.msk.f32.mxu1 %vm91_vm0, %v81_v1 }
  0x15   :  { %30 = vsyncpa [#allocation3], 0  ;;  %5004 = vmatpush3.msra.mxu1 %v83_v0  ;;  %s6953_s27 = sld [smem:[#allocation7_spill]]  ;;  %vm197_vm1 = vcmask 130048   ;;  %v330_v4 = vld [vmem:[%s6916_s10 + $0x18] sm:$0xff]  ;;  %v329_v5 = vld [vmem:[%s6916_s10 + $0x10] sm:$0xff] }
  0x16   :  { %5006 = vmatmul.mubr.msk.f32.vlgmr.msra.gmra.mxu1 %vm91_vm0, %v82_v2  ;;  %5024 = vmatprep.subr.mxu0 %v330_v4  ;;  %s6954_s29 = sld [smem:[#allocation14_spill]]  ;;  %v472_v12 = vld [vmem:[%s6917_s11 + $0x18] sm:$0xff]  ;;  %v471_v14 = vld [vmem:[%s6917_s11 + $0x10] sm:$0xff]  ;;  %v470_v16 = vld [vmem:[%s6917_s11 + $0x8] sm:$0xff]  ;;  %vm331_vm2 = vcmask 261120   ;;  %vm848_vm3 = vcmask 523264  }
  0x17   :  { %5025 = vmatpush3.msra.mxu0 %v330_v4  ;;  %v328_v21 = vld [vmem:[%s6916_s10 + $0x8] sm:$0xff]  ;;  %v469_v22 = vld [vmem:[%s6917_s11] sm:$0xff]  ;;  %v581_v24 = vld [vmem:[%s6918_s12 + $0x18] sm:$0xff]  ;;  %s6955_s1 = sld [smem:[#allocation8_spill]]  ;;  %vm5801_vm4 = vmmov 0   ;;  %vm4250_vm5 = vcmask 195584  }
  0x18   :  { %5026 = vmatprep.subr.mxu0 %v329_v5  ;;  %v327_v23 = vld [vmem:[%s6916_s10] sm:$0xff]  ;;  %v580_v27 = vld [vmem:[%s6918_s12 + $0x10] sm:$0xff]  ;;  %v579_v30 = vld [vmem:[%s6918_s12 + $0x8] sm:$0xff]  ;;  %s6956_s28 = sld [smem:[#allocation6_spill]]  ;;  %vm4324_vm6 = vcmask 17408  }
  0x19   :  { %5027 = vmatpush3.msra.mxu0 %v329_v5  ;;  %v578_v33 = vld [vmem:[%s6918_s12] sm:$0xff]  ;;  %s6957_s6 = sld [smem:[#allocation9_spill]] }
  0x1a   :  { %5028 = vmatprep.subr.mxu0 %v328_v21  ;;  %s6961_s7 = sld [smem:[#allocation11_spill]] }
  0x1b   :  { %v173_v3 = vld [vmem:[%s6953_s27] sm:$0xff]  ;;  %v174_v11 = vld [vmem:[%s6953_s27 + $0x8] sm:$0xff]  ;;  %v175_v13 = vld [vmem:[%s6953_s27 + $0x10] sm:$0xff]  ;;  %5029 = vmatpush3.msra.mxu0 %v328_v21 }
  0x1c   :  { %5012 = vmatprep.mubr.msk.f32.mxu1 %vm197_vm1, %v173_v3  ;;  %v4340_v6 = vld [vmem:[%s6954_s29] ss:$0 sm:$0xff]  ;;  %v176_v15 = vld [vmem:[%s6953_s27 + $0x18] sm:$0xff]  ;;  %v178_v18 = vld [vmem:[%s6953_s27 + $0x28] sm:$0xff]  ;;  %5030 = vmatprep.subr.mxu0 %v327_v23  ;;  %s6958_s29 = sld [smem:[#allocation15_spill]] }
  0x1d   :  { %v177_v17 = vld [vmem:[%s6953_s27 + $0x20] sm:$0xff]  ;;  %v179_v19 = vld [vmem:[%s6953_s27 + $0x30] sm:$0xff]  ;;  %v180_v20 = vld [vmem:[%s6953_s27 + $0x38] sm:$0xff]  ;;  %5031 = vmatpush3.msra.mxu0 %v327_v23 }
  0x1e   :  { %5064 = vmatprep.subr.mxu0 %v581_v24  ;;  %v6050_v38 = vld [vmem:[%s6955_s1] sm:$0xff]  ;;  %v188_v60 = vld [vmem:[%s6955_s1 + $0x38] sm:$0xff]  ;;  %v187_v63 = vld [vmem:[%s6955_s1 + $0x30] sm:$0xff] }
  0x1f   :  { %v186_v2 = vld [vmem:[%s6955_s1 + $0x28] sm:$0xff]  ;;  %v185_v4 = vld [vmem:[%s6955_s1 + $0x20] sm:$0xff] }
  0x20   :  { %v189_v23 = vld [vmem:[%s6956_s28] sm:$0xff] }
  0xd6   :  { %v5007_v7 = vpop.f32.mrf.mxu1 }
  0xd7   :  { %v5955_v8 = vadd.f32 %v5007_v7, %v4340_v6 }
  0xd8   :  { %v164_v9 = vpop.f32.mrf.mxu1 }
  0xd9   :  { %v5957_v10 = vadd.f32 %v4340_v6, %v164_v9  ;;  %5008 = vmatprep.subr.mxu1 %v5955_v8  ;;  %v184_v6 = vld [vmem:[%s6955_s1 + $0x18] sm:$0xff]  ;;  %v183_v9 = vld [vmem:[%s6955_s1 + $0x10] sm:$0xff] }
  0xda   :  { %5009 = vmatpush3.msra.mxu1 %v5955_v8 }
  0xdb   :  { %5010 = vmatprep.subr.mxu1 %v5957_v10 }
  0xdc   :  { %5011 = vmatpush3.msra.mxu1 %v5957_v10 }
  0xdd   :  { %5013 = vmatmul.mubr.msk.f32.vlgmr.msra.gmra.mxu1 %vm197_vm1, %v174_v11  ;;  %5044 = vmatprep.subr.mxu1 %v472_v12 }
  0xde   :  { %5015 = vmatprep.mubr.msk.f32.mxu1 %vm197_vm1, %v175_v13  ;;  %5045 = vmatpush3.msra.mxu1 %v472_v12  ;;  %v182_v12 = vld [vmem:[%s6955_s1 + $0x8] sm:$0xff] }
  0xdf   :  { %5046 = vmatprep.subr.mxu1 %v471_v14 }
  0xe0   :  { %5047 = vmatpush3.msra.mxu1 %v471_v14 }
  0xe1   :  { %5016 = vmatmul.mubr.msk.f32.gmra.mxu1 %vm197_vm1, %v176_v15  ;;  %5048 = vmatprep.subr.mxu1 %v470_v16 }
  0xe2   :  { %5018 = vmatprep.mubr.msk.f32.mxu1 %vm197_vm1, %v177_v17  ;;  %5049 = vmatpush3.msra.mxu1 %v470_v16 }
  0xe3   :  { %5050 = vmatprep.subr.mxu1 %v469_v22 }
  0xe4   :  { %5051 = vmatpush3.msra.mxu1 %v469_v22 }
  0xe5   :  { %5019 = vmatmul.mubr.msk.f32.gmra.mxu1 %vm197_vm1, %v178_v18 }
  0xe6   :  { %5021 = vmatprep.mubr.msk.f32.mxu1 %vm197_vm1, %v179_v19 }
  0xe9   :  { %5022 = vmatmul.mubr.msk.f32.gmra.mxu1 %vm197_vm1, %v180_v20 }
 0x19d   :  { %v5014_v25 = vpop.f32.mrf.mxu1 }
 0x19f   :  { %v288_v26 = vpop.f32.mrf.mxu1 }
 0x1a0   :  { %5032 = vmatprep.mubr.msk.f32.mxu0 %vm331_vm2, %v288_v26  ;;  %5052 = vmatprep.mubr.msk.f32.mxu1 %vm331_vm2, %v288_v26 }
 0x1a1   :  { %v5017_v28 = vpop.f32.mrf.mxu1  ;;  %5033 = vmatmul.mubr.msk.f32.vlgmr.msra.gmra.mxu0 %vm331_vm2, %v5014_v25  ;;  %5053 = vmatmul.mubr.msk.f32.vlgmr.msra.gmra.mxu1 %vm331_vm2, %v5014_v25 }
 0x1a2   :  { %5065 = vmatpush3.msra.mxu0 %v581_v24  ;;  %v190_v24 = vld [vmem:[%s6956_s28 + $0x8] sm:$0xff] }
 0x1a3   :  { %v298_v29 = vpop.f32.mrf.mxu1  ;;  %5066 = vmatprep.subr.mxu0 %v580_v27 }
 0x1a4   :  { %5035 = vmatprep.mubr.msk.f32.mxu0 %vm331_vm2, %v298_v29  ;;  %5055 = vmatprep.mubr.msk.f32.mxu1 %vm331_vm2, %v298_v29 }
 0x1a5   :  { %v5020_v31 = vpop.f32.mrf.mxu1  ;;  %5036 = vmatmul.mubr.msk.f32.gmra.mxu0 %vm331_vm2, %v5017_v28  ;;  %5056 = vmatmul.mubr.msk.f32.gmra.mxu1 %vm331_vm2, %v5017_v28 }
 0x1a6   :  { %5067 = vmatpush3.msra.mxu0 %v580_v27 }
 0x1a7   :  { %v308_v32 = vpop.f32.mrf.mxu1  ;;  %5068 = vmatprep.subr.mxu0 %v579_v30 }
 0x1a8   :  { %5038 = vmatprep.mubr.msk.f32.mxu0 %vm331_vm2, %v308_v32  ;;  %5058 = vmatprep.mubr.msk.f32.mxu1 %vm331_vm2, %v308_v32 }
 0x1a9   :  { %v5023_v34 = vpop.f32.mrf.mxu1  ;;  %5039 = vmatmul.mubr.msk.f32.gmra.mxu0 %vm331_vm2, %v5020_v31  ;;  %5059 = vmatmul.mubr.msk.f32.gmra.mxu1 %vm331_vm2, %v5020_v31 }
 0x1aa   :  { %5069 = vmatpush3.msra.mxu0 %v579_v30 }
 0x1ab   :  { %v318_v35 = vpop.f32.mrf.mxu1  ;;  %5070 = vmatprep.subr.mxu0 %v578_v33 }
 0x1ac   :  { %5041 = vmatprep.mubr.msk.f32.mxu0 %vm331_vm2, %v318_v35  ;;  %5061 = vmatprep.mubr.msk.f32.mxu1 %vm331_vm2, %v318_v35 }
 0x1ad   :  { %5042 = vmatmul.mubr.msk.f32.gmra.mxu0 %vm331_vm2, %v5023_v34  ;;  %5062 = vmatmul.mubr.msk.f32.gmra.mxu1 %vm331_vm2, %v5023_v34 }
 0x1ae   :  { %5072 = vmatprep.mubr.msk.f32.mxu0 %vm331_vm2, %v288_v26  ;;  %5071 = vmatpush3.msra.mxu0 %v578_v33 }
 0x1b1   :  { %5073 = vmatmul.mubr.msk.f32.vlgmr.msra.gmra.mxu0 %vm331_vm2, %v5014_v25 }
 0x1b2   :  { %5075 = vmatprep.mubr.msk.f32.mxu0 %vm331_vm2, %v298_v29 }
 0x1b5   :  { %5076 = vmatmul.mubr.msk.f32.gmra.mxu0 %vm331_vm2, %v5017_v28  ;;  %v191_v28 = vld [vmem:[%s6956_s28 + $0x10] sm:$0xff] }
 0x1b6   :  { %5078 = vmatprep.mubr.msk.f32.mxu0 %vm331_vm2, %v308_v32 }
 0x1b9   :  { %5079 = vmatmul.mubr.msk.f32.gmra.mxu0 %vm331_vm2, %v5020_v31  ;;  %v192_v31 = vld [vmem:[%s6956_s28 + $0x18] sm:$0xff] }
 0x1ba   :  { %5081 = vmatprep.mubr.msk.f32.mxu0 %vm331_vm2, %v318_v35  ;;  %v193_v35 = vld [vmem:[%s6956_s28 + $0x20] sm:$0xff] }
 0x1bd   :  { %5082 = vmatmul.mubr.msk.f32.gmra.mxu0 %vm331_vm2, %v5023_v34 }
 0x261   :  { %v6045_v36 = vpop.f32.mrf.mxu0  ;;  %v5054_v37 = vpop.f32.mrf.mxu1 }
 0x262   :  { %v462_v14 = vmul.f32 %v6045_v36, %v182_v12 }
 0x263   :  { %v422_v39 = vpop.f32.mrf.mxu0  ;;  %v6052_v40 = vpop.f32.mrf.mxu1 }
 0x264   :  { %v461_v41 = vmul.f32 %v422_v39, %v6050_v38  ;;  %v194_v39 = vld [vmem:[%s6956_s28 + $0x28] sm:$0xff] }
 0x265   :  { %v6055_v42 = vpop.f32.mrf.mxu0  ;;  %v5057_v43 = vpop.f32.mrf.mxu1 }
 0x266   :  { %5100 = vmatprep.mubr.msk.f32.mxu1 %vm331_vm2, %v461_v41  ;;  %v464_v17 = vmul.f32 %v6055_v42, %v184_v6 }
 0x267   :  { %v6058_v44 = vpop.f32.mrf.mxu0  ;;  %v549_v45 = vpop.f32.mrf.mxu1 }
 0x268   :  { %v463_v16 = vmul.f32 %v6058_v44, %v183_v9 }
 0x269   :  { %v6060_v46 = vpop.f32.mrf.mxu0  ;;  %v5060_v47 = vpop.f32.mrf.mxu1 }
 0x26a   :  { %v466_v19 = vmul.f32 %v6060_v46, %v186_v2 }
 0x26b   :  { %v6062_v48 = vpop.f32.mrf.mxu0  ;;  %v559_v49 = vpop.f32.mrf.mxu1 }
 0x26c   :  { %v465_v18 = vmul.f32 %v6062_v48, %v185_v4 }
 0x26d   :  { %v6064_v50 = vpop.f32.mrf.mxu0  ;;  %v5063_v51 = vpop.f32.mrf.mxu1 }
 0x26e   :  { %5084 = vmatprep.subr.msk.mxu1 %vm331_vm2, %v5063_v51  ;;  %v468_v21 = vmul.f32 %v6064_v50, %v188_v60 }
 0x26f   :  { %v6067_v52 = vpop.f32.mrf.mxu0  ;;  %v569_v53 = vpop.f32.mrf.mxu1  ;;  %5085 = vmatpush3.xpose.msk.msra.mxu1 %vm331_vm2, %v5063_v51 }
 0x270   :  { %5086 = vmatprep.subr.msk.mxu1 %vm331_vm2, %v569_v53  ;;  %v467_v20 = vmul.f32 %v6067_v52, %v187_v63 }
 0x271   :  { %v5074_v54 = vpop.f32.mrf.mxu0 }
 0x272   :  { %v688_v13 = vmul.f32 %v5074_v54, %v182_v12 }
 0x273   :  { %v648_v55 = vpop.f32.mrf.mxu0  ;;  %5087 = vmatpush3.xpose.msk.msra.mxu1 %vm331_vm2, %v569_v53 }
 0x274   :  { %5088 = vmatprep.subr.msk.mxu1 %vm331_vm2, %v5060_v47  ;;  %v687_v15 = vmul.f32 %v648_v55, %v6050_v38 }
 0x275   :  { %v5077_v56 = vpop.f32.mrf.mxu0 }
 0x276   :  { %v690_v7 = vmul.f32 %v5077_v56, %v184_v6 }
 0x277   :  { %v658_v57 = vpop.f32.mrf.mxu0  ;;  %5089 = vmatpush3.xpose.msk.msra.mxu1 %vm331_vm2, %v5060_v47  ;;  %v196_v47 = vld [vmem:[%s6956_s28 + $0x38] sm:$0xff] }
 0x278   :  { %5090 = vmatprep.subr.msk.mxu1 %vm331_vm2, %v559_v49  ;;  %v689_v11 = vmul.f32 %v658_v57, %v183_v9 }
 0x279   :  { %v5080_v58 = vpop.f32.mrf.mxu0 }
 0x27a   :  { %v692_v3 = vmul.f32 %v5080_v58, %v186_v2 }
 0x27b   :  { %v668_v59 = vpop.f32.mrf.mxu0  ;;  %5091 = vmatpush3.xpose.msk.msra.mxu1 %vm331_vm2, %v559_v49 }
 0x27c   :  { %5092 = vmatprep.subr.msk.mxu1 %vm331_vm2, %v5057_v43  ;;  %v691_v5 = vmul.f32 %v668_v59, %v185_v4 }
 0x27d   :  { %v5083_v61 = vpop.f32.mrf.mxu0 }
 0x27e   :  { %v694_v62 = vmul.f32 %v5083_v61, %v188_v60 }
 0x27f   :  { %v678_v0 = vpop.f32.mrf.mxu0  ;;  %5093 = vmatpush3.xpose.msk.msra.mxu1 %vm331_vm2, %v5057_v43  ;;  %v195_v43 = vld [vmem:[%s6956_s28 + $0x30] sm:$0xff] }
 0x280   :  { %v693_v1 = vmul.f32 %v678_v0, %v187_v63  ;;  %5094 = vmatprep.subr.msk.mxu1 %vm331_vm2, %v549_v45  ;;  %5112 = vmatprep.subr.mxu0 %v694_v62 }
 0x281   :  { %5113 = vmatpush3.msra.mxu0 %v694_v62 }
 0x282   :  { %5114 = vmatprep.subr.mxu0 %v693_v1 }
 0x283   :  { %5095 = vmatpush3.xpose.msk.msra.mxu1 %vm331_vm2, %v549_v45  ;;  %5115 = vmatpush3.msra.mxu0 %v693_v1 }
 0x284   :  { %5096 = vmatprep.subr.msk.mxu1 %vm331_vm2, %v5054_v37  ;;  %5116 = vmatprep.subr.mxu0 %v692_v3 }
 0x285   :  { %5117 = vmatpush3.msra.mxu0 %v692_v3 }
 0x286   :  { %5118 = vmatprep.subr.mxu0 %v691_v5 }
 0x287   :  { %5097 = vmatpush3.xpose.msk.msra.mxu1 %vm331_vm2, %v5054_v37  ;;  %5119 = vmatpush3.msra.mxu0 %v691_v5 }
 0x288   :  { %5098 = vmatprep.subr.msk.mxu1 %vm331_vm2, %v6052_v40  ;;  %5120 = vmatprep.subr.mxu0 %v690_v7 }
 0x289   :  { %5121 = vmatpush3.msra.mxu0 %v690_v7 }
 0x28a   :  { %5122 = vmatprep.subr.mxu0 %v689_v11 }
 0x28b   :  { %5099 = vmatpush3.xpose.msk.msra.mxu1 %vm331_vm2, %v6052_v40  ;;  %5123 = vmatpush3.msra.mxu0 %v689_v11 }
 0x28c   :  { %5124 = vmatprep.subr.mxu0 %v688_v13 }
 0x28d   :  { %5125 = vmatpush3.msra.mxu0 %v688_v13 }
 0x28e   :  { %5101 = vmatmul.mubr.msk.f32.vlgmr.msra.gmra.mxu1 %vm331_vm2, %v462_v14  ;;  %5126 = vmatprep.subr.mxu0 %v687_v15 }
 0x28f   :  { %5103 = vmatprep.mubr.msk.f32.mxu1 %vm331_vm2, %v463_v16  ;;  %5127 = vmatpush3.msra.mxu0 %v687_v15 }
 0x292   :  { %5104 = vmatmul.mubr.msk.f32.gmra.mxu1 %vm331_vm2, %v464_v17 }
 0x293   :  { %5106 = vmatprep.mubr.msk.f32.mxu1 %vm331_vm2, %v465_v18 }
 0x296   :  { %5107 = vmatmul.mubr.msk.f32.gmra.mxu1 %vm331_vm2, %v466_v19 }
 0x297   :  { %5109 = vmatprep.mubr.msk.f32.mxu1 %vm331_vm2, %v467_v20 }
 0x29a   :  { %5110 = vmatmul.mubr.msk.f32.gmra.mxu1 %vm331_vm2, %v468_v21 }
 0x34e   :  { %v5102_v22 = vpop.f32.mrf.mxu1 }
 0x34f   :  { %v815_v29 = vadd.f32 %v5102_v22, %v190_v24 }
 0x350   :  { %v809_v25 = vpop.f32.mrf.mxu1 }
 0x351   :  { %v810_v26 = vadd.f32 %v809_v25, %v189_v23  ;;  %v852_v38 = vsel %vm848_vm3, %v815_v29, -inf }
 0x352   :  { %v5105_v27 = vpop.f32.mrf.mxu1 }
 0x353   :  { %v849_v30 = vsel %vm848_vm3, %v810_v26, -inf  ;;  %v825_v36 = vadd.f32 %v5105_v27, %v192_v31 }
 0x354   :  { %v819_v32 = vpop.f32.mrf.mxu1  ;;  %850 = vmax.xlane.f32.xlu0 %v849_v30 }
 0x355   :  { %v820_v33 = vadd.f32 %v819_v32, %v191_v28  ;;  %v858_v45 = vsel %vm848_vm3, %v825_v36, -inf  ;;  %v4412_v32 = vld [vmem:[%s6919_s13 + $0x38] sm:$0xff] }
 0x356   :  { %v5108_v34 = vpop.f32.mrf.mxu1  ;;  %5160 = vmatprep.subr.mxu1 %v4412_v32 }
 0x357   :  { %v855_v37 = vsel %vm848_vm3, %v820_v33, -inf  ;;  %v835_v44 = vadd.f32 %v5108_v34, %v194_v39  ;;  %v4411_v34 = vld [vmem:[%s6919_s13 + $0x30] sm:$0xff]  ;;  %5161 = vmatpush3.msra.mxu1 %v4412_v32 }
 0x358   :  { %v829_v40 = vpop.f32.mrf.mxu1  ;;  %856 = vmax.xlane.f32.xlu1 %v855_v37  ;;  %853 = vmax.xlane.f32.xlu0 %v852_v38  ;;  %v4429_v32 = vld [vmem:[%s6919_s13 + $0x50] sm:$0xff] }
 0x359   :  { %v830_v41 = vadd.f32 %v829_v40, %v193_v35  ;;  %v864_v51 = vsel %vm848_vm3, %v835_v44, -inf  ;;  %v4410_v35 = vld [vmem:[%s6919_s13 + $0x28] sm:$0xff]  ;;  %5162 = vmatprep.subr.mxu1 %v4411_v34 }
 0x35a   :  { %v5111_v42 = vpop.f32.mrf.mxu1  ;;  %5163 = vmatpush3.msra.mxu1 %v4411_v34  ;;  %v4428_v34 = vld [vmem:[%s6919_s13 + $0x48] sm:$0xff] }
 0x35b   :  { %v861_v46 = vsel %vm848_vm3, %v830_v41, -inf  ;;  %v845_v50 = vadd.f32 %v5111_v42, %v196_v47  ;;  %5164 = vmatprep.subr.mxu1 %v4410_v35 }
 0x35c   :  { %859 = vmax.xlane.f32.xlu1 %v858_v45  ;;  %862 = vmax.xlane.f32.xlu0 %v861_v46  ;;  %v839_v48 = vpop.f32.mrf.mxu1 }
 0x35d   :  { %v840_v49 = vadd.f32 %v839_v48, %v195_v43  ;;  %v870_v53 = vsel %vm848_vm3, %v845_v50, -inf  ;;  %5165 = vmatpush3.msra.mxu1 %v4410_v35  ;;  %v4444_v35 = vld [vmem:[%s6919_s13 + $0x68] sm:$0xff] }
 0x35f   :  { %v867_v52 = vsel %vm848_vm3, %v840_v49, -inf }
 0x360   :  { %865 = vmax.xlane.f32.xlu1 %v864_v51  ;;  %868 = vmax.xlane.f32.xlu0 %v867_v52  ;;  %v1069_v52 = vld [vmem:[%s6919_s13 + $0x8] sm:$0xff] }
 0x364   :  { %871 = vmax.xlane.f32.xlu1 %v870_v53 }
 0x3dd   :  { %v851_v54 = vpop.xlane.xlu0 %850 }
 0x3de   :  { %v873_v55 = vsub.f32 %v810_v26, %v851_v54 }
 0x3e0   :  { %v881_v56 = vmul.f32 1.442695, %v873_v55 }
 0x3e1   :  { %v857_v57 = vpop.xlane.xlu1 %856  ;;  %v854_v58 = vpop.xlane.xlu0 %853 }
 0x3e2   :  { %5674 = vpow2.f32 %v881_v56  ;;  %v875_v59 = vsub.f32 %v820_v33, %v857_v57  ;;  %v874_v60 = vsub.f32 %v815_v29, %v854_v58  ;;  %v1071_v33 = vld [vmem:[%s6919_s13 + $0x18] sm:$0xff] }
 0x3e3   :  { %5140 = vmatprep.subr.mxu0 %v1071_v33 }
 0x3e4   :  { %v885_v61 = vmul.f32 1.442695, %v875_v59  ;;  %v883_v62 = vmul.f32 1.442695, %v874_v60 }
 0x3e5   :  { %v860_v63 = vpop.xlane.xlu1 %859  ;;  %v863_v0 = vpop.xlane.xlu0 %862 }
 0x3e6   :  { %5676 = vpow2.f32 %v885_v61  ;;  %v876_v1 = vsub.f32 %v825_v36, %v860_v63  ;;  %v877_v2 = vsub.f32 %v830_v41, %v863_v0  ;;  %v1068_v63 = vld [vmem:[%s6919_s13] sm:$0xff] }
 0x3e7   :  { %5678 = vpow2.f32 %v883_v62  ;;  %v4409_v62 = vld [vmem:[%s6919_s13 + $0x20] sm:$0xff] }
 0x3e8   :  { %v887_v3 = vmul.f32 1.442695, %v876_v1  ;;  %v889_v4 = vmul.f32 1.442695, %v877_v2  ;;  %5166 = vmatprep.subr.mxu1 %v4409_v62 }
 0x3e9   :  { %v866_v5 = vpop.xlane.xlu1 %865  ;;  %v869_v6 = vpop.xlane.xlu0 %868  ;;  %5167 = vmatpush3.msra.mxu1 %v4409_v62  ;;  %v4426_v62 = vld [vmem:[%s6957_s6 + $0x28] sm:$0xff] }
 0x3ea   :  { %5680 = vpow2.f32 %v887_v3  ;;  %v878_v7 = vsub.f32 %v835_v44, %v866_v5  ;;  %v879_v9 = vsub.f32 %v840_v49, %v869_v6 }
 0x3eb   :  { %5682 = vpow2.f32 %v889_v4 }
 0x3ec   :  { %v891_v11 = vmul.f32 1.442695, %v878_v7  ;;  %v893_v12 = vmul.f32 1.442695, %v879_v9  ;;  %v4407_v9 = vld [vmem:[%s6957_s6 + $0x10] sm:$0xff] }
 0x3ed   :  { %v872_v13 = vpop.xlane.xlu1 %871 }
 0x3ee   :  { %5684 = vpow2.f32 %v891_v11  ;;  %v880_v14 = vsub.f32 %v845_v50, %v872_v13  ;;  %v1070_v50 = vld [vmem:[%s6919_s13 + $0x10] sm:$0xff]  ;;  %v1066_v11 = vld [vmem:[%s6957_s6] sm:$0xff] }
 0x3ef   :  { %v5675_v15 = vpop.eup %5674  ;;  %5686 = vpow2.f32 %v893_v12 }
 0x3f0   :  { %v895_v16 = vmul.f32 1.442695, %v880_v14  ;;  %v897_v17 = vsel %vm848_vm3, %v5675_v15, 0.0 }
 0x3f1   :  { %898 = vadd.xlane.f32.xlu0 %v897_v17 }
 0x3f2   :  { %5688 = vpow2.f32 %v895_v16 }
 0x3f3   :  { %v5677_v18 = vpop.eup %5676 }
 0x3f4   :  { %v5679_v19 = vpop.eup %5678  ;;  %v903_v20 = vsel %vm848_vm3, %v5677_v18, 0.0 }
 0x3f5   :  { %v900_v21 = vsel %vm848_vm3, %v5679_v19, 0.0  ;;  %904 = vadd.xlane.f32.xlu0 %v903_v20 }
 0x3f6   :  { %901 = vadd.xlane.f32.xlu1 %v900_v21 }
 0x3f7   :  { %v5681_v22 = vpop.eup %5680 }
 0x3f8   :  { %v5683_v23 = vpop.eup %5682  ;;  %v906_v24 = vsel %vm848_vm3, %v5681_v22, 0.0 }
 0x3f9   :  { %v909_v25 = vsel %vm848_vm3, %v5683_v23, 0.0 }
 0x3fa   :  { %907 = vadd.xlane.f32.xlu1 %v906_v24  ;;  %910 = vadd.xlane.f32.xlu0 %v909_v25 }
 0x3fb   :  { %v5685_v26 = vpop.eup %5684 }
 0x3fc   :  { %v5687_v27 = vpop.eup %5686  ;;  %v912_v28 = vsel %vm848_vm3, %v5685_v26, 0.0 }
 0x3fd   :  { %v915_v29 = vsel %vm848_vm3, %v5687_v27, 0.0 }
 0x3fe   :  { %913 = vadd.xlane.f32.xlu1 %v912_v28  ;;  %916 = vadd.xlane.f32.xlu0 %v915_v29  ;;  %v4408_v28 = vld [vmem:[%s6957_s6 + $0x18] sm:$0xff]  ;;  %v1067_v29 = vld [vmem:[%s6957_s6 + $0x8] sm:$0xff] }
 0x3ff   :  { %v5689_v30 = vpop.eup %5688 }
 0x400   :  { %v918_v31 = vsel %vm848_vm3, %v5689_v30, 0.0 }
 0x402   :  { %919 = vadd.xlane.f32.xlu1 %v918_v31  ;;  %v4446_v31 = vld [vmem:[%s6919_s13 + $0x78] sm:$0xff] }
 0x47a   :  { %v899_v36 = vpop.xlane.xlu0 %898 }
 0x47b   :  { %5690 = vrcp.f32 %v899_v36  ;;  %v4427_v36 = vld [vmem:[%s6919_s13 + $0x40] sm:$0xff] }
 0x47e   :  { %v905_v37 = vpop.xlane.xlu0 %904 }
 0x47f   :  { %v902_v38 = vpop.xlane.xlu1 %901  ;;  %5692 = vrcp.f32 %v905_v37  ;;  %v4443_v37 = vld [vmem:[%s6919_s13 + $0x60] sm:$0xff] }
 0x480   :  { %5694 = vrcp.f32 %v902_v38  ;;  %v4425_v38 = vld [vmem:[%s6957_s6 + $0x20] sm:$0xff] }
 0x483   :  { %v908_v39 = vpop.xlane.xlu1 %907  ;;  %v911_v40 = vpop.xlane.xlu0 %910 }
 0x484   :  { %5696 = vrcp.f32 %v908_v39  ;;  %v4441_v39 = vld [vmem:[%s6957_s6 + $0x30] sm:$0xff] }
 0x485   :  { %5698 = vrcp.f32 %v911_v40 }
 0x487   :  { %v914_v41 = vpop.xlane.xlu1 %913  ;;  %v917_v42 = vpop.xlane.xlu0 %916 }
 0x488   :  { %v5691_v43 = vpop.eup %5690  ;;  %5700 = vrcp.f32 %v914_v41 }
 0x489   :  { %5702 = vrcp.f32 %v917_v42  ;;  %v929_v44 = vmul.f32 %v5691_v43, %v5675_v15 }
 0x48b   :  { %v920_v45 = vpop.xlane.xlu1 %919  ;;  %5128 = vmatprep.mubr.msk.f32.mxu0 %vm848_vm3, %v929_v44 }
 0x48c   :  { %v5693_v46 = vpop.eup %5692  ;;  %5704 = vrcp.f32 %v920_v45 }
 0x48d   :  { %v5695_v47 = vpop.eup %5694  ;;  %v931_v48 = vmul.f32 %v5693_v46, %v5677_v18 }
 0x48e   :  { %v930_v49 = vmul.f32 %v5695_v47, %v5679_v19 }
 0x490   :  { %5129 = vmatmul.mubr.msk.f32.vlgmr.msra.gmra.mxu0 %vm848_vm3, %v930_v49 }
 0x491   :  { %v5697_v51 = vpop.eup %5696  ;;  %5131 = vmatprep.mubr.msk.f32.mxu0 %vm848_vm3, %v931_v48  ;;  %5141 = vmatpush3.msra.mxu0 %v1071_v33  ;;  %v4445_v33 = vld [vmem:[%s6919_s13 + $0x70] sm:$0xff] }
 0x492   :  { %v5699_v53 = vpop.eup %5698  ;;  %v932_v54 = vmul.f32 %v5697_v51, %v5681_v22  ;;  %5142 = vmatprep.subr.mxu0 %v1070_v50 }
 0x493   :  { %v933_v55 = vmul.f32 %v5699_v53, %v5683_v23  ;;  %5143 = vmatpush3.msra.mxu0 %v1070_v50 }
 0x494   :  { %5132 = vmatmul.mubr.msk.f32.gmra.mxu0 %vm848_vm3, %v932_v54  ;;  %5144 = vmatprep.subr.mxu0 %v1069_v52 }
 0x495   :  { %v5701_v56 = vpop.eup %5700  ;;  %5134 = vmatprep.mubr.msk.f32.mxu0 %vm848_vm3, %v933_v55  ;;  %5145 = vmatpush3.msra.mxu0 %v1069_v52 }
 0x496   :  { %v5703_v57 = vpop.eup %5702  ;;  %v934_v58 = vmul.f32 %v5701_v56, %v5685_v26  ;;  %5146 = vmatprep.subr.mxu0 %v1068_v63 }
 0x497   :  { %v935_v59 = vmul.f32 %v5703_v57, %v5687_v27  ;;  %5147 = vmatpush3.msra.mxu0 %v1068_v63  ;;  %v4442_v63 = vld [vmem:[%s6957_s6 + $0x38] sm:$0xff] }
 0x498   :  { %5135 = vmatmul.mubr.msk.f32.gmra.mxu0 %vm848_vm3, %v934_v58 }
 0x499   :  { %v5705_v60 = vpop.eup %5704  ;;  %5137 = vmatprep.mubr.msk.f32.mxu0 %vm848_vm3, %v935_v59 }
 0x49a   :  { %v936_v61 = vmul.f32 %v5705_v60, %v5689_v30  ;;  %v4430_v30 = vld [vmem:[%s6919_s13 + $0x58] sm:$0xff] }
 0x49c   :  { %5138 = vmatmul.mubr.msk.f32.gmra.mxu0 %vm848_vm3, %v936_v61 }
 0x550   :  { %v6194_v0 = vpop.f32.mrf.mxu0 }
 0x552   :  { %v6196_v1 = vpop.f32.mrf.mxu0 }
 0x553   :  { %5148 = vmatprep.mubr.msk.f32.mxu0 %vm331_vm2, %v6196_v1  ;;  %5168 = vmatprep.mubr.msk.f32.mxu1 %vm331_vm2, %v6196_v1 }
 0x554   :  { %v6202_v2 = vpop.f32.mrf.mxu0  ;;  %5149 = vmatmul.mubr.msk.f32.vlgmr.msra.gmra.mxu0 %vm331_vm2, %v6194_v0  ;;  %5169 = vmatmul.mubr.msk.f32.vlgmr.msra.gmra.mxu1 %vm331_vm2, %v6194_v0 }
 0x556   :  { %v6208_v3 = vpop.f32.mrf.mxu0 }
 0x557   :  { %5151 = vmatprep.mubr.msk.f32.mxu0 %vm331_vm2, %v6208_v3  ;;  %5171 = vmatprep.mubr.msk.f32.mxu1 %vm331_vm2, %v6208_v3 }
 0x558   :  { %v6214_v4 = vpop.f32.mrf.mxu0  ;;  %5152 = vmatmul.mubr.msk.f32.gmra.mxu0 %vm331_vm2, %v6202_v2  ;;  %5172 = vmatmul.mubr.msk.f32.gmra.mxu1 %vm331_vm2, %v6202_v2 }
 0x55a   :  { %v6220_v5 = vpop.f32.mrf.mxu0 }
 0x55b   :  { %5154 = vmatprep.mubr.msk.f32.mxu0 %vm331_vm2, %v6220_v5  ;;  %5174 = vmatprep.mubr.msk.f32.mxu1 %vm331_vm2, %v6220_v5 }
 0x55c   :  { %v6226_v6 = vpop.f32.mrf.mxu0  ;;  %5155 = vmatmul.mubr.msk.f32.gmra.mxu0 %vm331_vm2, %v6214_v4  ;;  %5175 = vmatmul.mubr.msk.f32.gmra.mxu1 %vm331_vm2, %v6214_v4 }
 0x55e   :  { %v6232_v7 = vpop.f32.mrf.mxu0 }
 0x55f   :  { %5157 = vmatprep.mubr.msk.f32.mxu0 %vm331_vm2, %v6232_v7  ;;  %5177 = vmatprep.mubr.msk.f32.mxu1 %vm331_vm2, %v6232_v7 }
 0x560   :  { %5158 = vmatmul.mubr.msk.f32.gmra.mxu0 %vm331_vm2, %v6226_v6  ;;  %5178 = vmatmul.mubr.msk.f32.gmra.mxu1 %vm331_vm2, %v6226_v6 }
 0x561   :  { %5196 = vmatprep.mubr.msk.f32.mxu0 %vm848_vm3, %v4407_v9  ;;  %5215 = vmatprep.mubr.msk.f32.mxu1 %vm848_vm3, %v1066_v11  ;;  %v4457_v11 = vld [vmem:[%s6920_s14] ss:$0 sm:$0xff] }
 0x614   :  { %v5150_v12 = vpop.f32.mrf.mxu0  ;;  %v5170_v13 = vpop.f32.mrf.mxu1 }
 0x616   :  { %v1162_v14 = vpop.f32.mrf.mxu0  ;;  %v1275_v15 = vpop.f32.mrf.mxu1 }
 0x618   :  { %v5153_v16 = vpop.f32.mrf.mxu0  ;;  %v5173_v17 = vpop.f32.mrf.mxu1 }
 0x61a   :  { %v1172_v18 = vpop.f32.mrf.mxu0  ;;  %v1285_v19 = vpop.f32.mrf.mxu1 }
 0x61c   :  { %v5156_v20 = vpop.f32.mrf.mxu0  ;;  %v5176_v21 = vpop.f32.mrf.mxu1 }
 0x61e   :  { %v1182_v22 = vpop.f32.mrf.mxu0  ;;  %v1295_v23 = vpop.f32.mrf.mxu1 }
 0x620   :  { %v5159_v24 = vpop.f32.mrf.mxu0  ;;  %v5179_v25 = vpop.f32.mrf.mxu1 }
 0x621   :  { %5180 = vmatprep.subr.mxu0 %v5179_v25  ;;  %5199 = vmatprep.subr.mxu1 %v5159_v24 }
 0x622   :  { %v1192_v26 = vpop.f32.mrf.mxu0  ;;  %v1305_v27 = vpop.f32.mrf.mxu1  ;;  %5181 = vmatpush3.msra.mxu0 %v5179_v25  ;;  %5200 = vmatpush3.msra.mxu1 %v5159_v24 }
 0x623   :  { %5182 = vmatprep.subr.mxu0 %v1305_v27  ;;  %5201 = vmatprep.subr.mxu1 %v1192_v26 }
 0x624   :  { %5183 = vmatpush3.msra.mxu0 %v1305_v27  ;;  %5202 = vmatpush3.msra.mxu1 %v1192_v26 }
 0x625   :  { %5184 = vmatprep.subr.mxu0 %v5176_v21  ;;  %5203 = vmatprep.subr.mxu1 %v5156_v20 }
 0x626   :  { %5185 = vmatpush3.msra.mxu0 %v5176_v21  ;;  %5204 = vmatpush3.msra.mxu1 %v5156_v20 }
 0x627   :  { %5186 = vmatprep.subr.mxu0 %v1295_v23  ;;  %5205 = vmatprep.subr.mxu1 %v1182_v22 }
 0x628   :  { %5187 = vmatpush3.msra.mxu0 %v1295_v23  ;;  %5206 = vmatpush3.msra.mxu1 %v1182_v22 }
 0x629   :  { %5188 = vmatprep.subr.mxu0 %v5173_v17  ;;  %5207 = vmatprep.subr.mxu1 %v5153_v16 }
 0x62a   :  { %5189 = vmatpush3.msra.mxu0 %v5173_v17  ;;  %5208 = vmatpush3.msra.mxu1 %v5153_v16 }
 0x62b   :  { %5190 = vmatprep.subr.mxu0 %v1285_v19  ;;  %5209 = vmatprep.subr.mxu1 %v1172_v18 }
 0x62c   :  { %5191 = vmatpush3.msra.mxu0 %v1285_v19  ;;  %5210 = vmatpush3.msra.mxu1 %v1172_v18 }
 0x62d   :  { %5192 = vmatprep.subr.mxu0 %v5170_v13  ;;  %5211 = vmatprep.subr.mxu1 %v5150_v12 }
 0x62e   :  { %5193 = vmatpush3.msra.mxu0 %v5170_v13  ;;  %5212 = vmatpush3.msra.mxu1 %v5150_v12 }
 0x62f   :  { %5194 = vmatprep.subr.mxu0 %v1275_v15  ;;  %5213 = vmatprep.subr.mxu1 %v1162_v14 }
 0x630   :  { %5195 = vmatpush3.msra.mxu0 %v1275_v15  ;;  %5214 = vmatpush3.msra.mxu1 %v1162_v14 }
 0x631   :  { %5197 = vmatmul.mubr.msk.f32.vlgmr.msra.gmra.mxu0 %vm848_vm3, %v4408_v28  ;;  %5216 = vmatmul.mubr.msk.f32.vlgmr.msra.gmra.mxu1 %vm848_vm3, %v1067_v29 }
 0x632   :  { %5218 = vmatprep.subr.mxu0 %v4430_v30  ;;  %5257 = vmatprep.subr.mxu1 %v4446_v31 }
 0x633   :  { %5219 = vmatpush3.msra.mxu0 %v4430_v30  ;;  %5226 = vmatprep.mubr.msk.f32.mxu0 %vm331_vm2, %v6196_v1 }
 0x634   :  { %5258 = vmatpush3.msra.mxu1 %v4446_v31  ;;  %5265 = vmatprep.mubr.msk.f32.mxu1 %vm331_vm2, %v6196_v1  ;;  %v1928_v1 = vld [vmem:[%s6921_s15 + $0x18] sm:$0xff] }
 0x635   :  { %5220 = vmatprep.subr.mxu0 %v4429_v32  ;;  %5259 = vmatprep.subr.mxu1 %v4445_v33 }
 0x636   :  { %5221 = vmatpush3.msra.mxu0 %v4429_v32  ;;  %5260 = vmatpush3.msra.mxu1 %v4445_v33 }
 0x637   :  { %5222 = vmatprep.subr.mxu0 %v4428_v34  ;;  %5261 = vmatprep.subr.mxu1 %v4444_v35 }
 0x638   :  { %5223 = vmatpush3.msra.mxu0 %v4428_v34  ;;  %5262 = vmatpush3.msra.mxu1 %v4444_v35 }
 0x639   :  { %5224 = vmatprep.subr.mxu0 %v4427_v36  ;;  %5263 = vmatprep.subr.mxu1 %v4443_v37 }
 0x63a   :  { %5225 = vmatpush3.msra.mxu0 %v4427_v36  ;;  %5264 = vmatpush3.msra.mxu1 %v4443_v37 }
 0x63b   :  { %5227 = vmatmul.mubr.msk.f32.vlgmr.msra.gmra.mxu0 %vm331_vm2, %v6194_v0  ;;  %5266 = vmatmul.mubr.msk.f32.vlgmr.msra.gmra.mxu1 %vm331_vm2, %v6194_v0  ;;  %v5746_v0 = vld [vmem:[%s6953_s27] sm:$0xff] }
 0x63c   :  { %5229 = vmatprep.mubr.msk.f32.mxu0 %vm331_vm2, %v6208_v3  ;;  %5268 = vmatprep.mubr.msk.f32.mxu1 %vm331_vm2, %v6208_v3  ;;  %v1926_v3 = vld [vmem:[%s6921_s15 + $0x8] sm:$0xff] }
 0x63f   :  { %5230 = vmatmul.mubr.msk.f32.gmra.mxu0 %vm331_vm2, %v6202_v2  ;;  %5269 = vmatmul.mubr.msk.f32.gmra.mxu1 %vm331_vm2, %v6202_v2  ;;  %v1927_v2 = vld [vmem:[%s6921_s15 + $0x10] sm:$0xff] }
 0x640   :  { %5232 = vmatprep.mubr.msk.f32.mxu0 %vm331_vm2, %v6220_v5  ;;  %5271 = vmatprep.mubr.msk.f32.mxu1 %vm331_vm2, %v6220_v5  ;;  %v2026_v5 = vld [vmem:[%s6923_s17 + $0x38] sm:$0xff] }
 0x643   :  { %5233 = vmatmul.mubr.msk.f32.gmra.mxu0 %vm331_vm2, %v6214_v4  ;;  %5272 = vmatmul.mubr.msk.f32.gmra.mxu1 %vm331_vm2, %v6214_v4  ;;  %v1925_v4 = vld [vmem:[%s6921_s15] sm:$0xff] }
 0x644   :  { %5235 = vmatprep.mubr.msk.f32.mxu0 %vm331_vm2, %v6232_v7  ;;  %5274 = vmatprep.mubr.msk.f32.mxu1 %vm331_vm2, %v6232_v7 }
 0x647   :  { %5236 = vmatmul.mubr.msk.f32.gmra.mxu0 %vm331_vm2, %v6226_v6  ;;  %5275 = vmatmul.mubr.msk.f32.gmra.mxu1 %vm331_vm2, %v6226_v6 }
 0x648   :  { %5254 = vmatprep.mubr.msk.f32.mxu0 %vm848_vm3, %v4425_v38  ;;  %5293 = vmatprep.mubr.msk.f32.mxu1 %vm848_vm3, %v4441_v39 }
 0x6f1   :  { %v5198_v40 = vpop.f32.mrf.mxu0  ;;  %v5217_v41 = vpop.f32.mrf.mxu1 }
 0x6f2   :  { %v6322_v42 = vadd.f32 %v5217_v41, %v5198_v40 }
 0x6f3   :  { %v1386_v43 = vpop.f32.mrf.mxu0  ;;  %v1467_v44 = vpop.f32.mrf.mxu1 }
 0x6f4   :  { %v6324_v45 = vadd.f32 %v1467_v44, %v1386_v43 }
 0x6fb   :  { %v5228_v46 = vpop.f32.mrf.mxu0  ;;  %v5267_v47 = vpop.f32.mrf.mxu1 }
 0x6fd   :  { %v1550_v48 = vpop.f32.mrf.mxu0  ;;  %v1746_v49 = vpop.f32.mrf.mxu1 }
 0x6ff   :  { %v5231_v50 = vpop.f32.mrf.mxu0  ;;  %v5270_v51 = vpop.f32.mrf.mxu1 }
 0x701   :  { %v1560_v52 = vpop.f32.mrf.mxu0  ;;  %v1756_v53 = vpop.f32.mrf.mxu1 }
 0x703   :  { %v5234_v54 = vpop.f32.mrf.mxu0  ;;  %v5273_v55 = vpop.f32.mrf.mxu1 }
 0x705   :  { %v1570_v56 = vpop.f32.mrf.mxu0  ;;  %v1766_v57 = vpop.f32.mrf.mxu1 }
 0x707   :  { %v5237_v58 = vpop.f32.mrf.mxu0  ;;  %v5276_v59 = vpop.f32.mrf.mxu1 }
 0x708   :  { %5238 = vmatprep.subr.mxu0 %v5237_v58  ;;  %5277 = vmatprep.subr.mxu1 %v5276_v59 }
 0x709   :  { %v1580_v60 = vpop.f32.mrf.mxu0  ;;  %5239 = vmatpush3.msra.mxu0 %v5237_v58  ;;  %v1776_v61 = vpop.f32.mrf.mxu1  ;;  %5278 = vmatpush3.msra.mxu1 %v5276_v59  ;;  %v2025_v58 = vld [vmem:[%s6923_s17 + $0x30] sm:$0xff]  ;;  %v2024_v59 = vld [vmem:[%s6923_s17 + $0x28] sm:$0xff] }
 0x70a   :  { %5240 = vmatprep.subr.mxu0 %v1580_v60  ;;  %5279 = vmatprep.subr.mxu1 %v1776_v61 }
 0x70b   :  { %5241 = vmatpush3.msra.mxu0 %v1580_v60  ;;  %5280 = vmatpush3.msra.mxu1 %v1776_v61  ;;  %v2023_v60 = vld [vmem:[%s6923_s17 + $0x20] sm:$0xff]  ;;  %v2022_v61 = vld [vmem:[%s6923_s17 + $0x18] sm:$0xff] }
 0x70c   :  { %5242 = vmatprep.subr.mxu0 %v5234_v54  ;;  %5281 = vmatprep.subr.mxu1 %v5273_v55 }
 0x70d   :  { %5243 = vmatpush3.msra.mxu0 %v5234_v54  ;;  %5282 = vmatpush3.msra.mxu1 %v5273_v55 }
 0x70e   :  { %5244 = vmatprep.subr.mxu0 %v1570_v56  ;;  %5283 = vmatprep.subr.mxu1 %v1766_v57 }
 0x70f   :  { %5245 = vmatpush3.msra.mxu0 %v1570_v56  ;;  %5284 = vmatpush3.msra.mxu1 %v1766_v57 }
 0x710   :  { %5246 = vmatprep.subr.mxu0 %v5231_v50  ;;  %5285 = vmatprep.subr.mxu1 %v5270_v51 }
 0x711   :  { %5247 = vmatpush3.msra.mxu0 %v5231_v50  ;;  %5286 = vmatpush3.msra.mxu1 %v5270_v51 }
 0x712   :  { %5248 = vmatprep.subr.mxu0 %v1560_v52  ;;  %5287 = vmatprep.subr.mxu1 %v1756_v53 }
 0x713   :  { %5249 = vmatpush3.msra.mxu0 %v1560_v52  ;;  %5288 = vmatpush3.msra.mxu1 %v1756_v53  ;;  %v4458_v53 = vld [vmem:[%s6926_s20] ss:$0 sm:$0xff] }
 0x714   :  { %5250 = vmatprep.subr.mxu0 %v5228_v46  ;;  %5289 = vmatprep.subr.mxu1 %v5267_v47 }
 0x715   :  { %5251 = vmatpush3.msra.mxu0 %v5228_v46  ;;  %5290 = vmatpush3.msra.mxu1 %v5267_v47  ;;  %v1910_v46 = vlaneseq }
 0x716   :  { %5252 = vmatprep.subr.mxu0 %v1550_v48  ;;  %5291 = vmatprep.subr.mxu1 %v1746_v49 }
 0x717   :  { %5253 = vmatpush3.msra.mxu0 %v1550_v48  ;;  %5292 = vmatpush3.msra.mxu1 %v1746_v49  ;;  %v1911_v47 = vshrl.u32 %v1910_v46, 7  ;;  %v1879_v48 = vld [vmem:[%s6925_s19] sm:$0x1] }
 0x718   :  { %5255 = vmatmul.mubr.msk.f32.vlgmr.msra.gmra.mxu0 %vm848_vm3, %v4426_v62  ;;  %5294 = vmatmul.mubr.msk.f32.vlgmr.msra.gmra.mxu1 %vm848_vm3, %v4442_v63  ;;  %v2021_v62 = vld [vmem:[%s6923_s17 + $0x10] sm:$0xff]  ;;  %v2020_v63 = vld [vmem:[%s6923_s17 + $0x8] sm:$0xff] }
 0x719   :  { %5330 = vmatprep.mubr.msk.f32.mxu1 %vm197_vm1, %v5746_v0  ;;  %5296 = vmatprep.subr.mxu0 %v1928_v1  ;;  %v6367_v49 = vsub.s32 0, %v1911_v47  ;;  %v2019_v0 = vld [vmem:[%s6923_s17] sm:$0xff] }
 0x71a   :  { %5297 = vmatpush3.msra.mxu0 %v1928_v1  ;;  %v4459_v1 = vld [vmem:[%s6922_s16] ss:$0 sm:$0xff] }
 0x71b   :  { %5298 = vmatprep.subr.mxu0 %v1927_v2 }
 0x71c   :  { %5299 = vmatpush3.msra.mxu0 %v1927_v2 }
 0x71d   :  { %5300 = vmatprep.subr.mxu0 %v1926_v3 }
 0x71e   :  { %5301 = vmatpush3.msra.mxu0 %v1926_v3 }
 0x71f   :  { %5302 = vmatprep.subr.mxu0 %v1925_v4 }
 0x720   :  { %5303 = vmatpush3.msra.mxu0 %v1925_v4 }
 0x721   :  { %5307 = vmatprep.subr.mxu0 %v2026_v5 }
 0x7d8   :  { %v5256_v6 = vpop.f32.mrf.mxu0  ;;  %v5295_v7 = vpop.f32.mrf.mxu1 }
 0x7d9   :  { %v1671_v9 = vadd.f32 %v5256_v6, %v6322_v42 }
 0x7da   :  { %v1661_v12 = vpop.f32.mrf.mxu0  ;;  %v1857_v15 = vpop.f32.mrf.mxu1 }
 0x7db   :  { %v1867_v13 = vadd.f32 %v5295_v7, %v1671_v9  ;;  %v1670_v14 = vadd.f32 %v1661_v12, %v6324_v45  ;;  %v4489_v9 = vld [vmem:[%s6917_s11 + $0x38] sm:$0xff]  ;;  %v4462_v12 = vld [vmem:[%s6958_s29] ss:$0 sm:$0xff] }
 0x7dd   :  { %v1876_v16 = vadd.f32 %v4457_v11, %v1867_v13  ;;  %v1866_v17 = vadd.f32 %v1857_v15, %v1670_v14 }
 0x7df   :  { %v1878_v18 = vadd.f32 %v1876_v16, %v5955_v8  ;;  %v1875_v19 = vadd.f32 %v4457_v11, %v1866_v17  ;;  %v4488_v11 = vld [vmem:[%s6917_s11 + $0x30] sm:$0xff] }
 0x7e1   :  { %v1877_v20 = vadd.f32 %v1875_v19, %v5957_v10  ;;  %v1882_v21 = vsel %vm331_vm2, %v1878_v18, 0.0 }
 0x7e3   :  { %v1881_v22 = vsel %vm331_vm2, %v1877_v20, 0.0 }
 0x7e4   :  { %v1883_v23 = vadd.f32 %v1882_v21, %v1881_v22 }
 0x7e6   :  { %v1884_v24 = vrot.slane %v1883_v23, 4 }
 0x7e8   :  { %v1885_v25 = vadd.f32 %v1884_v24, %v1883_v23 }
 0x7ea   :  { %v1886_v26 = vrot.slane %v1885_v25, 2 }
 0x7ec   :  { %v1887_v27 = vadd.f32 %v1886_v26, %v1885_v25 }
 0x7ee   :  { %v1888_v28 = vrot.slane %v1887_v27, 1 }
 0x7f0   :  { %v1889_v29 = vadd.f32 %v1888_v28, %v1887_v27 }
 0x7f2   :  { %v1891_v30 = vmul.f32 0.0625, %v1889_v29 }
 0x7f4   :  { %v1892_v31 = vsub.f32 %v1877_v20, %v1891_v30  ;;  %v1893_v32 = vsub.f32 %v1878_v18, %v1891_v30 }
 0x7f6   :  { %v1894_v33 = vmul.f32 %v1892_v31, %v1892_v31  ;;  %v1895_v34 = vmul.f32 %v1893_v32, %v1893_v32 }
 0x7f8   :  { %v1896_v35 = vsel %vm331_vm2, %v1894_v33, 0.0  ;;  %v1897_v36 = vsel %vm331_vm2, %v1895_v34, 0.0 }
 0x7f9   :  { %v1898_v37 = vadd.f32 %v1897_v36, %v1896_v35 }
 0x7fb   :  { %v1899_v38 = vrot.slane %v1898_v37, 4 }
 0x7fd   :  { %v1900_v39 = vadd.f32 %v1899_v38, %v1898_v37 }
 0x7ff   :  { %v1901_v40 = vrot.slane %v1900_v39, 2 }
 0x801   :  { %v1902_v41 = vadd.f32 %v1901_v40, %v1900_v39 }
 0x803   :  { %v1903_v42 = vrot.slane %v1902_v41, 1 }
 0x805   :  { %v1904_v43 = vadd.f32 %v1903_v42, %v1902_v41 }
 0x807   :  { %v1905_v44 = vmul.f32 0.0625, %v1904_v43 }
 0x809   :  { %v1906_v45 = vadd.f32 1e-05, %v1905_v44  ;;  %v2117_v44 = vld [vmem:[%s6927_s21] sm:$0x1] }
 0x80b   :  { %5706 = vrsqrt.f32 %v1906_v45 }
 0x818   :  { %v5707_v50 = vpop.eup %5706 }
 0x819   :  { %v1908_v51 = vmul.f32 %v5707_v50, %v1879_v48  ;;  %v4465_v48 = vld [vmem:[%s6928_s22] ss:$0 sm:$0xff] }
 0x81b   :  { %v1913_v52 = vrot.slane %v1908_v51, %v6367_v49 }
 0x81d   :  { %v1915_v54 = vmul.f32 %v1913_v52, %v1892_v31  ;;  %v1916_v55 = vmul.f32 %v1913_v52, %v1893_v32 }
 0x81f   :  { %v1923_v56 = vadd.f32 %v4458_v53, %v1915_v54  ;;  %v1924_v57 = vadd.f32 %v4458_v53, %v1916_v55  ;;  %v4477_v54 = vld [vmem:[%s6916_s10 + $0x38] sm:$0xff]  ;;  %v4476_v55 = vld [vmem:[%s6916_s10 + $0x30] sm:$0xff] }
 0x821   :  { %5304 = vmatprep.mubr.msk.f32.mxu0 %vm331_vm2, %v1923_v56 }
 0x822   :  { %5305 = vmatmul.mubr.msk.f32.vlgmr.msra.gmra.mxu0 %vm331_vm2, %v1924_v57 }
 0x823   :  { %5308 = vmatpush3.msra.mxu0 %v2026_v5 }
 0x824   :  { %5309 = vmatprep.subr.mxu0 %v2025_v58 }
 0x825   :  { %5310 = vmatpush3.msra.mxu0 %v2025_v58  ;;  %v5749_v58 = vld [vmem:[%s6953_s27 + $0x18] sm:$0xff] }
 0x826   :  { %5311 = vmatprep.subr.mxu0 %v2024_v59 }
 0x827   :  { %5312 = vmatpush3.msra.mxu0 %v2024_v59  ;;  %v5750_v59 = vld [vmem:[%s6953_s27 + $0x20] sm:$0xff] }
 0x828   :  { %5313 = vmatprep.subr.mxu0 %v2023_v60 }
 0x829   :  { %5314 = vmatpush3.msra.mxu0 %v2023_v60  ;;  %v5751_v60 = vld [vmem:[%s6953_s27 + $0x28] sm:$0xff] }
 0x82a   :  { %5315 = vmatprep.subr.mxu0 %v2022_v61 }
 0x82b   :  { %5316 = vmatpush3.msra.mxu0 %v2022_v61  ;;  %v5752_v61 = vld [vmem:[%s6953_s27 + $0x30] sm:$0xff] }
 0x82c   :  { %5317 = vmatprep.subr.mxu0 %v2021_v62 }
 0x82d   :  { %5318 = vmatpush3.msra.mxu0 %v2021_v62  ;;  %v5753_v62 = vld [vmem:[%s6953_s27 + $0x38] sm:$0xff] }
 0x82e   :  { %5319 = vmatprep.subr.mxu0 %v2020_v63 }
 0x82f   :  { %5320 = vmatpush3.msra.mxu0 %v2020_v63  ;;  %v4475_v63 = vld [vmem:[%s6916_s10 + $0x28] sm:$0xff] }
 0x830   :  { %5321 = vmatprep.subr.mxu0 %v2019_v0 }
 0x831   :  { %5322 = vmatpush3.msra.mxu0 %v2019_v0  ;;  %v4487_v0 = vld [vmem:[%s6917_s11 + $0x28] sm:$0xff] }
 0x832   :  { %5362 = vmatprep.subr.mxu0 %v4489_v9 }
 0x8e2   :  { %v5306_v2 = vpop.f32.mrf.mxu0 }
 0x8e3   :  { %v2014_v3 = vadd.f32 %v5306_v2, %v4459_v1  ;;  %v4486_v2 = vld [vmem:[%s6917_s11 + $0x20] sm:$0xff]  ;;  %s6959_s11 = sld [smem:[#allocation12_spill]] }
 0x8e4   :  { %v2008_v4 = vpop.f32.mrf.mxu0 }
 0x8e5   :  { %v2009_v5 = vadd.f32 %v4459_v1, %v2008_v4  ;;  %v2018_v7 = vmax.f32 %v2014_v3, 0.0  ;;  %v4474_v1 = vld [vmem:[%s6916_s10 + $0x20] sm:$0xff]  ;;  %v4501_v3 = vld [vmem:[%s6918_s12 + $0x38] sm:$0xff] }
 0x8e7   :  { %v2017_v6 = vmax.f32 %v2009_v5, 0.0 }
 0x8e9   :  { %5323 = vmatprep.mubr.msk.f32.mxu0 %vm848_vm3, %v2017_v6  ;;  %v4500_v6 = vld [vmem:[%s6918_s12 + $0x30] sm:$0xff] }
 0x8ea   :  { %5324 = vmatmul.mubr.msk.f32.vlgmr.msra.gmra.mxu0 %vm848_vm3, %v2018_v7 }
 0x8eb   :  { %5363 = vmatpush3.msra.mxu0 %v4489_v9 }
 0x8ec   :  { %5364 = vmatprep.subr.mxu0 %v4488_v11 }
 0x8ed   :  { %5365 = vmatpush3.msra.mxu0 %v4488_v11  ;;  %v4499_v11 = vld [vmem:[%s6918_s12 + $0x28] sm:$0xff] }
 0x8ee   :  { %5366 = vmatprep.subr.mxu0 %v4487_v0 }
 0x8ef   :  { %5367 = vmatpush3.msra.mxu0 %v4487_v0 }
 0x8f0   :  { %5368 = vmatprep.subr.mxu0 %v4486_v2 }
 0x8f1   :  { %5369 = vmatpush3.msra.mxu0 %v4486_v2 }
 0x9aa   :  { %v5325_v13 = vpop.f32.mrf.mxu0 }
 0x9ab   :  { %v2112_v14 = vadd.f32 %v5325_v13, %v4462_v12 }
 0x9ac   :  { %v2106_v15 = vpop.f32.mrf.mxu0 }
 0x9ad   :  { %v2116_v16 = vadd.f32 %v2112_v14, %v1924_v57  ;;  %v2107_v17 = vadd.f32 %v4462_v12, %v2106_v15  ;;  %v5748_v57 = vld [vmem:[%s6953_s27 + $0x10] sm:$0xff]  ;;  %v4498_v14 = vld [vmem:[%s6918_s12 + $0x20] sm:$0xff] }
 0x9af   :  { %v2115_v18 = vadd.f32 %v2107_v17, %v1923_v56  ;;  %v2120_v19 = vsel %vm331_vm2, %v2116_v16, 0.0  ;;  %v5747_v56 = vld [vmem:[%s6953_s27 + $0x8] sm:$0xff] }
 0x9b1   :  { %v2119_v20 = vsel %vm331_vm2, %v2115_v18, 0.0 }
 0x9b2   :  { %v2121_v21 = vadd.f32 %v2120_v19, %v2119_v20 }
 0x9b4   :  { %v2122_v22 = vrot.slane %v2121_v21, 4 }
 0x9b6   :  { %v2123_v23 = vadd.f32 %v2122_v22, %v2121_v21  ;;  %v6510_v21 = vld [vmem:[%s6955_s1] sm:$0xff] }
 0x9b8   :  { %v2124_v24 = vrot.slane %v2123_v23, 2 }
 0x9ba   :  { %v2125_v25 = vadd.f32 %v2124_v24, %v2123_v23 }
 0x9bc   :  { %v2126_v26 = vrot.slane %v2125_v25, 1 }
 0x9be   :  { %v2127_v27 = vadd.f32 %v2126_v26, %v2125_v25 }
 0x9c0   :  { %v2128_v28 = vmul.f32 0.0625, %v2127_v27 }
 0x9c2   :  { %v2129_v29 = vsub.f32 %v2115_v18, %v2128_v28  ;;  %v2130_v30 = vsub.f32 %v2116_v16, %v2128_v28 }
 0x9c4   :  { %v2131_v31 = vmul.f32 %v2129_v29, %v2129_v29  ;;  %v2132_v32 = vmul.f32 %v2130_v30, %v2130_v30 }
 0x9c6   :  { %v2133_v33 = vsel %vm331_vm2, %v2131_v31, 0.0  ;;  %v2134_v34 = vsel %vm331_vm2, %v2132_v32, 0.0 }
 0x9c7   :  { %v2135_v35 = vadd.f32 %v2134_v34, %v2133_v33 }
 0x9c9   :  { %v2136_v36 = vrot.slane %v2135_v35, 4 }
 0x9cb   :  { %v2137_v37 = vadd.f32 %v2136_v36, %v2135_v35 }
 0x9cd   :  { %v2138_v38 = vrot.slane %v2137_v37, 2 }
 0x9cf   :  { %v2139_v39 = vadd.f32 %v2138_v38, %v2137_v37 }
 0x9d1   :  { %v2140_v40 = vrot.slane %v2139_v39, 1 }
 0x9d3   :  { %v2141_v41 = vadd.f32 %v2140_v40, %v2139_v39 }
 0x9d5   :  { %v2142_v42 = vmul.f32 0.0625, %v2141_v41 }
 0x9d7   :  { %v2143_v43 = vadd.f32 1e-05, %v2142_v42  ;;  %v5755_v42 = vld [vmem:[%s6955_s1 + $0x38] sm:$0xff] }
 0x9d9   :  { %5708 = vrsqrt.f32 %v2143_v43 }
 0x9e6   :  { %v5709_v45 = vpop.eup %5708 }
 0x9e7   :  { %v2145_v46 = vmul.f32 %v5709_v45, %v2117_v44  ;;  %v5756_v45 = vld [vmem:[%s6955_s1 + $0x30] sm:$0xff] }
 0x9e9   :  { %v2150_v47 = vrot.slane %v2145_v46, %v6367_v49 }
 0x9eb   :  { %v2153_v50 = vmul.f32 %v2150_v47, %v2130_v30  ;;  %v2152_v51 = vmul.f32 %v2150_v47, %v2129_v29  ;;  %v5757_v47 = vld [vmem:[%s6955_s1 + $0x28] sm:$0xff] }
 0x9ed   :  { %v2161_v52 = vadd.f32 %v4465_v48, %v2153_v50  ;;  %v2160_v53 = vadd.f32 %v4465_v48, %v2152_v51  ;;  %v5758_v50 = vld [vmem:[%s6955_s1 + $0x20] sm:$0xff] }
 0x9ef   :  { %5326 = vmatprep.subr.mxu1 %v2161_v52 }
 0x9f0   :  { %5327 = vmatpush3.msra.mxu1 %v2161_v52  ;;  %v5759_v52 = vld [vmem:[%s6955_s1 + $0x18] sm:$0xff] }
 0x9f1   :  { %5328 = vmatprep.subr.mxu1 %v2160_v53 }
 0x9f2   :  { %5329 = vmatpush3.msra.mxu1 %v2160_v53 }
 0x9f3   :  { %5331 = vmatmul.mubr.msk.f32.vlgmr.msra.gmra.mxu1 %vm197_vm1, %v5747_v56  ;;  %5342 = vmatprep.subr.mxu1 %v4477_v54  ;;  %v5761_v56 = vld [vmem:[%s6955_s1 + $0x8] sm:$0xff] }
 0x9f4   :  { %5333 = vmatprep.mubr.msk.f32.mxu1 %vm197_vm1, %v5748_v57  ;;  %5343 = vmatpush3.msra.mxu1 %v4477_v54  ;;  %v5760_v54 = vld [vmem:[%s6955_s1 + $0x10] sm:$0xff] }
 0x9f5   :  { %5344 = vmatprep.subr.mxu1 %v4476_v55 }
 0x9f6   :  { %5345 = vmatpush3.msra.mxu1 %v4476_v55 }
 0x9f7   :  { %5334 = vmatmul.mubr.msk.f32.gmra.mxu1 %vm197_vm1, %v5749_v58  ;;  %5346 = vmatprep.subr.mxu1 %v4475_v63 }
 0x9f8   :  { %5336 = vmatprep.mubr.msk.f32.mxu1 %vm197_vm1, %v5750_v59  ;;  %5347 = vmatpush3.msra.mxu1 %v4475_v63 }
 0x9f9   :  { %5348 = vmatprep.subr.mxu1 %v4474_v1 }
 0x9fa   :  { %5349 = vmatpush3.msra.mxu1 %v4474_v1 }
 0x9fb   :  { %5337 = vmatmul.mubr.msk.f32.gmra.mxu1 %vm197_vm1, %v5751_v60  ;;  %5382 = vmatprep.subr.mxu1 %v4501_v3 }
 0x9fc   :  { %5339 = vmatprep.mubr.msk.f32.mxu1 %vm197_vm1, %v5752_v61 }
 0x9ff   :  { %5340 = vmatmul.mubr.msk.f32.gmra.mxu1 %vm197_vm1, %v5753_v62 }
 0xab3   :  { %v5332_v4 = vpop.f32.mrf.mxu1 }
 0xab5   :  { %v2228_v5 = vpop.f32.mrf.mxu1 }
 0xab6   :  { %5350 = vmatprep.mubr.msk.f32.mxu1 %vm331_vm2, %v2228_v5  ;;  %5370 = vmatprep.mubr.msk.f32.mxu0 %vm331_vm2, %v2228_v5 }
 0xab7   :  { %v5335_v7 = vpop.f32.mrf.mxu1  ;;  %5351 = vmatmul.mubr.msk.f32.vlgmr.msra.gmra.mxu1 %vm331_vm2, %v5332_v4  ;;  %5371 = vmatmul.mubr.msk.f32.vlgmr.msra.gmra.mxu0 %vm331_vm2, %v5332_v4 }
 0xab8   :  { %5383 = vmatpush3.msra.mxu1 %v4501_v3  ;;  %v5762_v3 = vld [vmem:[%s6956_s28 + $0x8] sm:$0xff] }
 0xab9   :  { %v2238_v9 = vpop.f32.mrf.mxu1  ;;  %5384 = vmatprep.subr.mxu1 %v4500_v6 }
 0xaba   :  { %5353 = vmatprep.mubr.msk.f32.mxu1 %vm331_vm2, %v2238_v9  ;;  %5373 = vmatprep.mubr.msk.f32.mxu0 %vm331_vm2, %v2238_v9 }
 0xabb   :  { %v5338_v12 = vpop.f32.mrf.mxu1  ;;  %5354 = vmatmul.mubr.msk.f32.gmra.mxu1 %vm331_vm2, %v5335_v7  ;;  %5374 = vmatmul.mubr.msk.f32.gmra.mxu0 %vm331_vm2, %v5335_v7 }
 0xabc   :  { %5385 = vmatpush3.msra.mxu1 %v4500_v6  ;;  %v5763_v6 = vld [vmem:[%s6956_s28] sm:$0xff] }
 0xabd   :  { %v2248_v13 = vpop.f32.mrf.mxu1  ;;  %5386 = vmatprep.subr.mxu1 %v4499_v11 }
 0xabe   :  { %5356 = vmatprep.mubr.msk.f32.mxu1 %vm331_vm2, %v2248_v13  ;;  %5376 = vmatprep.mubr.msk.f32.mxu0 %vm331_vm2, %v2248_v13 }
 0xabf   :  { %v5341_v15 = vpop.f32.mrf.mxu1  ;;  %5357 = vmatmul.mubr.msk.f32.gmra.mxu1 %vm331_vm2, %v5338_v12  ;;  %5377 = vmatmul.mubr.msk.f32.gmra.mxu0 %vm331_vm2, %v5338_v12 }
 0xac0   :  { %5387 = vmatpush3.msra.mxu1 %v4499_v11 }
 0xac1   :  { %v2258_v16 = vpop.f32.mrf.mxu1  ;;  %5388 = vmatprep.subr.mxu1 %v4498_v14 }
 0xac2   :  { %5359 = vmatprep.mubr.msk.f32.mxu1 %vm331_vm2, %v2258_v16  ;;  %5379 = vmatprep.mubr.msk.f32.mxu0 %vm331_vm2, %v2258_v16 }
 0xac3   :  { %5360 = vmatmul.mubr.msk.f32.gmra.mxu1 %vm331_vm2, %v5341_v15  ;;  %5380 = vmatmul.mubr.msk.f32.gmra.mxu0 %vm331_vm2, %v5341_v15 }
 0xac4   :  { %5390 = vmatprep.mubr.msk.f32.mxu1 %vm331_vm2, %v2228_v5  ;;  %5389 = vmatpush3.msra.mxu1 %v4498_v14 }
 0xac7   :  { %5391 = vmatmul.mubr.msk.f32.vlgmr.msra.gmra.mxu1 %vm331_vm2, %v5332_v4 }
 0xac8   :  { %5393 = vmatprep.mubr.msk.f32.mxu1 %vm331_vm2, %v2238_v9 }
 0xacb   :  { %5394 = vmatmul.mubr.msk.f32.gmra.mxu1 %vm331_vm2, %v5335_v7 }
 0xacc   :  { %5396 = vmatprep.mubr.msk.f32.mxu1 %vm331_vm2, %v2248_v13 }
 0xacf   :  { %5397 = vmatmul.mubr.msk.f32.gmra.mxu1 %vm331_vm2, %v5338_v12  ;;  %v5764_v12 = vld [vmem:[%s6956_s28 + $0x18] sm:$0xff] }
 0xad0   :  { %5399 = vmatprep.mubr.msk.f32.mxu1 %vm331_vm2, %v2258_v16  ;;  %v5765_v16 = vld [vmem:[%s6956_s28 + $0x10] sm:$0xff] }
 0xad3   :  { %5400 = vmatmul.mubr.msk.f32.gmra.mxu1 %vm331_vm2, %v5341_v15 }
 0xb77   :  { %v6503_v17 = vpop.f32.mrf.mxu1  ;;  %v5372_v18 = vpop.f32.mrf.mxu0 }
 0xb78   :  { %v2402_v58 = vmul.f32 %v5761_v56, %v6503_v17 }
 0xb79   :  { %v2362_v19 = vpop.f32.mrf.mxu1  ;;  %v6505_v20 = vpop.f32.mrf.mxu0 }
 0xb7a   :  { %v2401_v22 = vmul.f32 %v6510_v21, %v2362_v19 }
 0xb7b   :  { %v6513_v23 = vpop.f32.mrf.mxu1  ;;  %v5375_v24 = vpop.f32.mrf.mxu0 }
 0xb7c   :  { %5418 = vmatprep.mubr.msk.f32.mxu0 %vm331_vm2, %v2401_v22  ;;  %v2404_v61 = vmul.f32 %v5759_v52, %v6513_v23 }
 0xb7d   :  { %v6516_v25 = vpop.f32.mrf.mxu1  ;;  %v2490_v26 = vpop.f32.mrf.mxu0 }
 0xb7e   :  { %v2403_v60 = vmul.f32 %v5760_v54, %v6516_v25 }
 0xb7f   :  { %v6518_v27 = vpop.f32.mrf.mxu1  ;;  %v5378_v28 = vpop.f32.mrf.mxu0 }
 0xb80   :  { %v2406_v63 = vmul.f32 %v5757_v47, %v6518_v27 }
 0xb81   :  { %v6520_v29 = vpop.f32.mrf.mxu1  ;;  %v2500_v30 = vpop.f32.mrf.mxu0 }
 0xb82   :  { %v2405_v62 = vmul.f32 %v5758_v50, %v6520_v29 }
 0xb83   :  { %v6522_v31 = vpop.f32.mrf.mxu1  ;;  %v5381_v32 = vpop.f32.mrf.mxu0 }
 0xb84   :  { %5402 = vmatprep.subr.msk.mxu0 %vm331_vm2, %v5381_v32  ;;  %v2408_v1 = vmul.f32 %v5755_v42, %v6522_v31 }
 0xb85   :  { %v6525_v33 = vpop.f32.mrf.mxu1  ;;  %v2510_v34 = vpop.f32.mrf.mxu0  ;;  %5403 = vmatpush3.xpose.msk.msra.mxu0 %vm331_vm2, %v5381_v32  ;;  %v5769_v32 = vld [vmem:[%s6956_s28 + $0x30] sm:$0xff] }
 0xb86   :  { %5404 = vmatprep.subr.msk.mxu0 %vm331_vm2, %v2510_v34  ;;  %v2407_v0 = vmul.f32 %v5756_v45, %v6525_v33 }
 0xb87   :  { %v5392_v35 = vpop.f32.mrf.mxu1 }
 0xb88   :  { %v2630_v57 = vmul.f32 %v5761_v56, %v5392_v35 }
 0xb89   :  { %v2590_v36 = vpop.f32.mrf.mxu1  ;;  %5405 = vmatpush3.xpose.msk.msra.mxu0 %vm331_vm2, %v2510_v34 }
 0xb8a   :  { %5406 = vmatprep.subr.msk.mxu0 %vm331_vm2, %v5378_v28  ;;  %v2629_v59 = vmul.f32 %v6510_v21, %v2590_v36 }
 0xb8b   :  { %v5395_v37 = vpop.f32.mrf.mxu1 }
 0xb8c   :  { %v2632_v53 = vmul.f32 %v5759_v52, %v5395_v37 }
 0xb8d   :  { %v2600_v38 = vpop.f32.mrf.mxu1  ;;  %5407 = vmatpush3.xpose.msk.msra.mxu0 %vm331_vm2, %v5378_v28  ;;  %v5768_v28 = vld [vmem:[%s6956_s28 + $0x38] sm:$0xff] }
 0xb8e   :  { %5408 = vmatprep.subr.msk.mxu0 %vm331_vm2, %v2500_v30  ;;  %v2631_v55 = vmul.f32 %v5760_v54, %v2600_v38 }
 0xb8f   :  { %v5398_v39 = vpop.f32.mrf.mxu1 }
 0xb90   :  { %v2634_v48 = vmul.f32 %v5757_v47, %v5398_v39 }
 0xb91   :  { %v2610_v40 = vpop.f32.mrf.mxu1  ;;  %5409 = vmatpush3.xpose.msk.msra.mxu0 %vm331_vm2, %v2500_v30 }
 0xb92   :  { %5410 = vmatprep.subr.msk.mxu0 %vm331_vm2, %v5375_v24  ;;  %v2633_v51 = vmul.f32 %v5758_v50, %v2610_v40 }
 0xb93   :  { %v5401_v41 = vpop.f32.mrf.mxu1 }
 0xb94   :  { %v2636_v43 = vmul.f32 %v5755_v42, %v5401_v41 }
 0xb95   :  { %v2620_v44 = vpop.f32.mrf.mxu1  ;;  %5411 = vmatpush3.xpose.msk.msra.mxu0 %vm331_vm2, %v5375_v24  ;;  %v5767_v24 = vld [vmem:[%s6956_s28 + $0x20] sm:$0xff] }
 0xb96   :  { %v2635_v46 = vmul.f32 %v5756_v45, %v2620_v44  ;;  %5412 = vmatprep.subr.msk.mxu0 %vm331_vm2, %v2490_v26  ;;  %5430 = vmatprep.subr.mxu1 %v2636_v43 }
 0xb97   :  { %5431 = vmatpush3.msra.mxu1 %v2636_v43 }
 0xb98   :  { %5432 = vmatprep.subr.mxu1 %v2635_v46 }
 0xb99   :  { %5413 = vmatpush3.xpose.msk.msra.mxu0 %vm331_vm2, %v2490_v26  ;;  %5433 = vmatpush3.msra.mxu1 %v2635_v46 }
 0xb9a   :  { %5414 = vmatprep.subr.msk.mxu0 %vm331_vm2, %v5372_v18  ;;  %5434 = vmatprep.subr.mxu1 %v2634_v48 }
 0xb9b   :  { %5435 = vmatpush3.msra.mxu1 %v2634_v48 }
 0xb9c   :  { %5436 = vmatprep.subr.mxu1 %v2633_v51 }
 0xb9d   :  { %5415 = vmatpush3.xpose.msk.msra.mxu0 %vm331_vm2, %v5372_v18  ;;  %5437 = vmatpush3.msra.mxu1 %v2633_v51 }
 0xb9e   :  { %5416 = vmatprep.subr.msk.mxu0 %vm331_vm2, %v6505_v20  ;;  %5438 = vmatprep.subr.mxu1 %v2632_v53 }
 0xb9f   :  { %5439 = vmatpush3.msra.mxu1 %v2632_v53 }
 0xba0   :  { %5440 = vmatprep.subr.mxu1 %v2631_v55 }
 0xba1   :  { %5417 = vmatpush3.xpose.msk.msra.mxu0 %vm331_vm2, %v6505_v20  ;;  %5441 = vmatpush3.msra.mxu1 %v2631_v55  ;;  %v5766_v20 = vld [vmem:[%s6956_s28 + $0x28] sm:$0xff] }
 0xba2   :  { %5442 = vmatprep.subr.mxu1 %v2630_v57 }
 0xba3   :  { %5443 = vmatpush3.msra.mxu1 %v2630_v57 }
 0xba4   :  { %5419 = vmatmul.mubr.msk.f32.vlgmr.msra.gmra.mxu0 %vm331_vm2, %v2402_v58  ;;  %5444 = vmatprep.subr.mxu1 %v2629_v59 }
 0xba5   :  { %5421 = vmatprep.mubr.msk.f32.mxu0 %vm331_vm2, %v2403_v60  ;;  %5445 = vmatpush3.msra.mxu1 %v2629_v59 }
 0xba8   :  { %5422 = vmatmul.mubr.msk.f32.gmra.mxu0 %vm331_vm2, %v2404_v61 }
 0xba9   :  { %5424 = vmatprep.mubr.msk.f32.mxu0 %vm331_vm2, %v2405_v62 }
 0xbac   :  { %5425 = vmatmul.mubr.msk.f32.gmra.mxu0 %vm331_vm2, %v2406_v63 }
 0xbad   :  { %5427 = vmatprep.mubr.msk.f32.mxu0 %vm331_vm2, %v2407_v0 }
 0xbb0   :  { %5428 = vmatmul.mubr.msk.f32.gmra.mxu0 %vm331_vm2, %v2408_v1 }
 0xc64   :  { %v5420_v2 = vpop.f32.mrf.mxu0 }
 0xc65   :  { %v2757_v4 = vadd.f32 %v5762_v3, %v5420_v2 }
 0xc66   :  { %v2751_v5 = vpop.f32.mrf.mxu0 }
 0xc67   :  { %v2752_v7 = vadd.f32 %v5763_v6, %v2751_v5  ;;  %v2793_v9 = vsel %vm848_vm3, %v2757_v4, -inf }
 0xc68   :  { %2794 = vmax.xlane.f32.xlu1 %v2793_v9  ;;  %v5423_v11 = vpop.f32.mrf.mxu0 }
 0xc69   :  { %v2767_v13 = vadd.f32 %v5764_v12, %v5423_v11  ;;  %v2790_v14 = vsel %vm848_vm3, %v2752_v7, -inf }
 0xc6a   :  { %2791 = vmax.xlane.f32.xlu0 %v2790_v14  ;;  %v2761_v15 = vpop.f32.mrf.mxu0 }
 0xc6b   :  { %v2762_v17 = vadd.f32 %v5765_v16, %v2761_v15  ;;  %v2799_v18 = vsel %vm848_vm3, %v2767_v13, -inf  ;;  %v4549_v15 = vld [vmem:[%s6919_s13 + $0xb8] sm:$0xff]  ;;  %v4548_v16 = vld [vmem:[%s6919_s13 + $0xb0] sm:$0xff] }
 0xc6c   :  { %2800 = vmax.xlane.f32.xlu1 %v2799_v18  ;;  %v5426_v19 = vpop.f32.mrf.mxu0  ;;  %5478 = vmatprep.subr.mxu0 %v4549_v15  ;;  %v4547_v18 = vld [vmem:[%s6919_s13 + $0xa8] sm:$0xff] }
 0xc6d   :  { %v2777_v21 = vadd.f32 %v5766_v20, %v5426_v19  ;;  %v2796_v22 = vsel %vm848_vm3, %v2762_v17, -inf  ;;  %5479 = vmatpush3.msra.mxu0 %v4549_v15  ;;  %v4564_v15 = vld [vmem:[%s6919_s13 + $0xd0] sm:$0xff] }
 0xc6e   :  { %2797 = vmax.xlane.f32.xlu0 %v2796_v22  ;;  %v2771_v23 = vpop.f32.mrf.mxu0  ;;  %5480 = vmatprep.subr.mxu0 %v4548_v16 }
 0xc6f   :  { %v2772_v25 = vadd.f32 %v5767_v24, %v2771_v23  ;;  %v2805_v26 = vsel %vm848_vm3, %v2777_v21, -inf  ;;  %5481 = vmatpush3.msra.mxu0 %v4548_v16  ;;  %v4563_v16 = vld [vmem:[%s6919_s13 + $0xc8] sm:$0xff] }
 0xc70   :  { %2806 = vmax.xlane.f32.xlu1 %v2805_v26  ;;  %v5429_v27 = vpop.f32.mrf.mxu0  ;;  %5482 = vmatprep.subr.mxu0 %v4547_v18 }
 0xc71   :  { %v2787_v29 = vadd.f32 %v5768_v28, %v5429_v27  ;;  %v2802_v30 = vsel %vm848_vm3, %v2772_v25, -inf  ;;  %5483 = vmatpush3.msra.mxu0 %v4547_v18  ;;  %v4562_v18 = vld [vmem:[%s6919_s13 + $0xc0] sm:$0xff] }
 0xc72   :  { %2803 = vmax.xlane.f32.xlu0 %v2802_v30  ;;  %v2781_v31 = vpop.f32.mrf.mxu0 }
 0xc73   :  { %v2782_v33 = vadd.f32 %v5769_v32, %v2781_v31  ;;  %v2811_v34 = vsel %vm848_vm3, %v2787_v29, -inf  ;;  %v4536_v32 = vld [vmem:[%s6919_s13 + $0x90] sm:$0xff] }
 0xc74   :  { %2812 = vmax.xlane.f32.xlu1 %v2811_v34 }
 0xc75   :  { %v2808_v35 = vsel %vm848_vm3, %v2782_v33, -inf }
 0xc76   :  { %2809 = vmax.xlane.f32.xlu0 %v2808_v35 }
 0xcf1   :  { %v2795_v36 = vpop.xlane.xlu1 %2794 }
 0xcf2   :  { %v2815_v37 = vsub.f32 %v2757_v4, %v2795_v36 }
 0xcf3   :  { %v2792_v38 = vpop.xlane.xlu0 %2791 }
 0xcf4   :  { %v2824_v39 = vmul.f32 1.442695, %v2815_v37  ;;  %v2814_v40 = vsub.f32 %v2752_v7, %v2792_v38 }
 0xcf5   :  { %v2801_v41 = vpop.xlane.xlu1 %2800 }
 0xcf6   :  { %5710 = vpow2.f32 %v2824_v39  ;;  %v2822_v42 = vmul.f32 1.442695, %v2814_v40  ;;  %v2817_v43 = vsub.f32 %v2767_v13, %v2801_v41 }
 0xcf7   :  { %v2798_v44 = vpop.xlane.xlu0 %2797 }
 0xcf8   :  { %5712 = vpow2.f32 %v2822_v42  ;;  %v2828_v45 = vmul.f32 1.442695, %v2817_v43  ;;  %v2816_v46 = vsub.f32 %v2762_v17, %v2798_v44  ;;  %v4537_v17 = vld [vmem:[%s6919_s13 + $0x98] sm:$0xff]  ;;  %v4535_v44 = vld [vmem:[%s6919_s13 + $0x88] sm:$0xff] }
 0xcf9   :  { %v2807_v47 = vpop.xlane.xlu1 %2806  ;;  %5458 = vmatprep.subr.mxu1 %v4537_v17 }
 0xcfa   :  { %5714 = vpow2.f32 %v2828_v45  ;;  %v2826_v48 = vmul.f32 1.442695, %v2816_v46  ;;  %v2819_v50 = vsub.f32 %v2777_v21, %v2807_v47  ;;  %v4546_v45 = vld [vmem:[%s6919_s13 + $0xa0] sm:$0xff] }
 0xcfb   :  { %v2804_v51 = vpop.xlane.xlu0 %2803  ;;  %5484 = vmatprep.subr.mxu0 %v4546_v45  ;;  %v4534_v46 = vld [vmem:[%s6919_s13 + $0x80] sm:$0xff] }
 0xcfc   :  { %5716 = vpow2.f32 %v2826_v48  ;;  %v2832_v52 = vmul.f32 1.442695, %v2819_v50  ;;  %v2818_v53 = vsub.f32 %v2772_v25, %v2804_v51  ;;  %5485 = vmatpush3.msra.mxu0 %v4546_v45  ;;  %v4597_v45 = vld [vmem:[%s6921_s15 + $0x30] sm:$0xff] }
 0xcfd   :  { %v2813_v54 = vpop.xlane.xlu1 %2812 }
 0xcfe   :  { %5718 = vpow2.f32 %v2832_v52  ;;  %v2830_v55 = vmul.f32 1.442695, %v2818_v53  ;;  %v2821_v56 = vsub.f32 %v2787_v29, %v2813_v54 }
 0xcff   :  { %v2810_v57 = vpop.xlane.xlu0 %2809 }
 0xd00   :  { %5720 = vpow2.f32 %v2830_v55  ;;  %v2836_v58 = vmul.f32 1.442695, %v2821_v56  ;;  %v2820_v59 = vsub.f32 %v2782_v33, %v2810_v57  ;;  %v5770_v56 = vld [vmem:[%s6957_s6 + $0x10] sm:$0xff]  ;;  %v5771_v57 = vld [vmem:[%s6957_s6] sm:$0xff] }
 0xd02   :  { %5722 = vpow2.f32 %v2836_v58  ;;  %v2834_v60 = vmul.f32 1.442695, %v2820_v59 }
 0xd03   :  { %v5711_v61 = vpop.eup %5710 }
 0xd04   :  { %5724 = vpow2.f32 %v2834_v60  ;;  %v2841_v62 = vsel %vm848_vm3, %v5711_v61, 0.0 }
 0xd05   :  { %v5713_v63 = vpop.eup %5712  ;;  %2842 = vadd.xlane.f32.xlu1 %v2841_v62 }
 0xd06   :  { %v2838_v0 = vsel %vm848_vm3, %v5713_v63, 0.0 }
 0xd07   :  { %v5715_v1 = vpop.eup %5714  ;;  %2839 = vadd.xlane.f32.xlu0 %v2838_v0 }
 0xd08   :  { %v2847_v2 = vsel %vm848_vm3, %v5715_v1, 0.0 }
 0xd09   :  { %v5717_v3 = vpop.eup %5716  ;;  %2848 = vadd.xlane.f32.xlu1 %v2847_v2 }
 0xd0a   :  { %v2844_v4 = vsel %vm848_vm3, %v5717_v3, 0.0 }
 0xd0b   :  { %v5719_v5 = vpop.eup %5718  ;;  %2845 = vadd.xlane.f32.xlu0 %v2844_v4 }
 0xd0c   :  { %v2853_v6 = vsel %vm848_vm3, %v5719_v5, 0.0 }
 0xd0d   :  { %v5721_v7 = vpop.eup %5720  ;;  %2854 = vadd.xlane.f32.xlu1 %v2853_v6 }
 0xd0e   :  { %v2850_v9 = vsel %vm848_vm3, %v5721_v7, 0.0 }
 0xd0f   :  { %v5723_v11 = vpop.eup %5722  ;;  %2851 = vadd.xlane.f32.xlu0 %v2850_v9 }
 0xd10   :  { %v2859_v12 = vsel %vm848_vm3, %v5723_v11, 0.0 }
 0xd11   :  { %v5725_v13 = vpop.eup %5724  ;;  %2860 = vadd.xlane.f32.xlu1 %v2859_v12  ;;  %v4565_v12 = vld [vmem:[%s6919_s13 + $0xd8] sm:$0xff] }
 0xd12   :  { %v2856_v14 = vsel %vm848_vm3, %v5725_v13, 0.0 }
 0xd13   :  { %2857 = vadd.xlane.f32.xlu0 %v2856_v14  ;;  %v5773_v14 = vld [vmem:[%s6957_s6 + $0x8] sm:$0xff] }
 0xd8e   :  { %v2843_v19 = vpop.xlane.xlu1 %2842 }
 0xd8f   :  { %5726 = vrcp.f32 %v2843_v19  ;;  %v4579_v19 = vld [vmem:[%s6919_s13 + $0xf8] sm:$0xff] }
 0xd90   :  { %v2840_v20 = vpop.xlane.xlu0 %2839 }
 0xd91   :  { %5728 = vrcp.f32 %v2840_v20  ;;  %v4578_v20 = vld [vmem:[%s6919_s13 + $0xf0] sm:$0xff] }
 0xd92   :  { %v2849_v21 = vpop.xlane.xlu1 %2848 }
 0xd93   :  { %5730 = vrcp.f32 %v2849_v21  ;;  %v4577_v21 = vld [vmem:[%s6919_s13 + $0xe8] sm:$0xff] }
 0xd94   :  { %v2846_v22 = vpop.xlane.xlu0 %2845 }
 0xd95   :  { %5732 = vrcp.f32 %v2846_v22  ;;  %v4576_v22 = vld [vmem:[%s6919_s13 + $0xe0] sm:$0xff] }
 0xd96   :  { %v2855_v23 = vpop.xlane.xlu1 %2854 }
 0xd97   :  { %5734 = vrcp.f32 %v2855_v23 }
 0xd98   :  { %v2852_v24 = vpop.xlane.xlu0 %2851 }
 0xd99   :  { %5736 = vrcp.f32 %v2852_v24 }
 0xd9a   :  { %v2861_v25 = vpop.xlane.xlu1 %2860 }
 0xd9b   :  { %5738 = vrcp.f32 %v2861_v25 }
 0xd9c   :  { %v2858_v26 = vpop.xlane.xlu0 %2857  ;;  %v5727_v27 = vpop.eup %5726 }
 0xd9d   :  { %5740 = vrcp.f32 %v2858_v26  ;;  %v2871_v30 = vmul.f32 %v5727_v27, %v5711_v61 }
 0xd9e   :  { %v5729_v28 = vpop.eup %5728 }
 0xd9f   :  { %v2870_v29 = vmul.f32 %v5729_v28, %v5713_v63 }
 0xda0   :  { %v5731_v31 = vpop.eup %5730 }
 0xda1   :  { %5446 = vmatprep.mubr.msk.f32.mxu1 %vm848_vm3, %v2870_v29  ;;  %v2873_v35 = vmul.f32 %v5731_v31, %v5715_v1 }
 0xda2   :  { %v5733_v33 = vpop.eup %5732  ;;  %5447 = vmatmul.mubr.msk.f32.vlgmr.msra.gmra.mxu1 %vm848_vm3, %v2871_v30 }
 0xda3   :  { %v2872_v34 = vmul.f32 %v5733_v33, %v5717_v3  ;;  %5459 = vmatpush3.msra.mxu1 %v4537_v17  ;;  %v5774_v17 = vld [vmem:[%s6957_s6 + $0x20] sm:$0xff] }
 0xda4   :  { %5460 = vmatprep.subr.mxu1 %v4536_v32  ;;  %v5735_v36 = vpop.eup %5734 }
 0xda5   :  { %5449 = vmatprep.mubr.msk.f32.mxu1 %vm848_vm3, %v2872_v34  ;;  %5461 = vmatpush3.msra.mxu1 %v4536_v32  ;;  %v2875_v39 = vmul.f32 %v5735_v36, %v5719_v5 }
 0xda6   :  { %v5737_v37 = vpop.eup %5736  ;;  %5450 = vmatmul.mubr.msk.f32.gmra.mxu1 %vm848_vm3, %v2873_v35  ;;  %5462 = vmatprep.subr.mxu1 %v4535_v44 }
 0xda7   :  { %v2874_v38 = vmul.f32 %v5737_v37, %v5721_v7  ;;  %5463 = vmatpush3.msra.mxu1 %v4535_v44  ;;  %v4598_v44 = vld [vmem:[%s6921_s15 + $0x38] sm:$0xff] }
 0xda8   :  { %v5739_v40 = vpop.eup %5738  ;;  %5464 = vmatprep.subr.mxu1 %v4534_v46 }
 0xda9   :  { %5452 = vmatprep.mubr.msk.f32.mxu1 %vm848_vm3, %v2874_v38  ;;  %v2877_v43 = vmul.f32 %v5739_v40, %v5723_v11  ;;  %5465 = vmatpush3.msra.mxu1 %v4534_v46  ;;  %v5775_v40 = vld [vmem:[%s6957_s6 + $0x28] sm:$0xff] }
 0xdaa   :  { %v5741_v41 = vpop.eup %5740  ;;  %5453 = vmatmul.mubr.msk.f32.gmra.mxu1 %vm848_vm3, %v2875_v39  ;;  %v4596_v46 = vld [vmem:[%s6921_s15 + $0x28] sm:$0xff] }
 0xdab   :  { %v2876_v42 = vmul.f32 %v5741_v41, %v5725_v13  ;;  %v5772_v13 = vld [vmem:[%s6957_s6 + $0x18] sm:$0xff] }
 0xdad   :  { %5455 = vmatprep.mubr.msk.f32.mxu1 %vm848_vm3, %v2876_v42  ;;  %v5776_v42 = vld [vmem:[%s6957_s6 + $0x30] sm:$0xff] }
 0xdae   :  { %5456 = vmatmul.mubr.msk.f32.gmra.mxu1 %vm848_vm3, %v2877_v43  ;;  %v5777_v43 = vld [vmem:[%s6957_s6 + $0x38] sm:$0xff] }
 0xe62   :  { %v6652_v47 = vpop.f32.mrf.mxu1 }
 0xe64   :  { %v6654_v48 = vpop.f32.mrf.mxu1 }
 0xe65   :  { %5466 = vmatprep.mubr.msk.f32.mxu1 %vm331_vm2, %v6654_v48  ;;  %5486 = vmatprep.mubr.msk.f32.mxu0 %vm331_vm2, %v6654_v48 }
 0xe66   :  { %v6660_v50 = vpop.f32.mrf.mxu1  ;;  %5467 = vmatmul.mubr.msk.f32.vlgmr.msra.gmra.mxu1 %vm331_vm2, %v6652_v47  ;;  %5487 = vmatmul.mubr.msk.f32.vlgmr.msra.gmra.mxu0 %vm331_vm2, %v6652_v47 }
 0xe68   :  { %v6666_v51 = vpop.f32.mrf.mxu1 }
 0xe69   :  { %5469 = vmatprep.mubr.msk.f32.mxu1 %vm331_vm2, %v6666_v51  ;;  %5489 = vmatprep.mubr.msk.f32.mxu0 %vm331_vm2, %v6666_v51 }
 0xe6a   :  { %v6672_v52 = vpop.f32.mrf.mxu1  ;;  %5470 = vmatmul.mubr.msk.f32.gmra.mxu1 %vm331_vm2, %v6660_v50  ;;  %5490 = vmatmul.mubr.msk.f32.gmra.mxu0 %vm331_vm2, %v6660_v50 }
 0xe6c   :  { %v6678_v53 = vpop.f32.mrf.mxu1 }
 0xe6d   :  { %5472 = vmatprep.mubr.msk.f32.mxu1 %vm331_vm2, %v6678_v53  ;;  %5492 = vmatprep.mubr.msk.f32.mxu0 %vm331_vm2, %v6678_v53 }
 0xe6e   :  { %v6684_v54 = vpop.f32.mrf.mxu1  ;;  %5473 = vmatmul.mubr.msk.f32.gmra.mxu1 %vm331_vm2, %v6672_v52  ;;  %5493 = vmatmul.mubr.msk.f32.gmra.mxu0 %vm331_vm2, %v6672_v52 }
 0xe70   :  { %v6690_v55 = vpop.f32.mrf.mxu1 }
 0xe71   :  { %5475 = vmatprep.mubr.msk.f32.mxu1 %vm331_vm2, %v6690_v55  ;;  %5495 = vmatprep.mubr.msk.f32.mxu0 %vm331_vm2, %v6690_v55 }
 0xe72   :  { %5476 = vmatmul.mubr.msk.f32.gmra.mxu1 %vm331_vm2, %v6684_v54  ;;  %5496 = vmatmul.mubr.msk.f32.gmra.mxu0 %vm331_vm2, %v6684_v54 }
 0xe73   :  { %5514 = vmatprep.mubr.msk.f32.mxu1 %vm848_vm3, %v5770_v56  ;;  %5533 = vmatprep.mubr.msk.f32.mxu0 %vm848_vm3, %v5771_v57 }
 0xf26   :  { %v5468_v58 = vpop.f32.mrf.mxu1  ;;  %v5488_v59 = vpop.f32.mrf.mxu0 }
 0xf28   :  { %v3102_v60 = vpop.f32.mrf.mxu1  ;;  %v3212_v61 = vpop.f32.mrf.mxu0 }
 0xf2a   :  { %v5471_v62 = vpop.f32.mrf.mxu1  ;;  %v5491_v63 = vpop.f32.mrf.mxu0 }
 0xf2c   :  { %v3112_v0 = vpop.f32.mrf.mxu1  ;;  %v3222_v1 = vpop.f32.mrf.mxu0 }
 0xf2e   :  { %v5474_v2 = vpop.f32.mrf.mxu1  ;;  %v5494_v3 = vpop.f32.mrf.mxu0 }
 0xf30   :  { %v3122_v4 = vpop.f32.mrf.mxu1  ;;  %v3232_v5 = vpop.f32.mrf.mxu0 }
 0xf32   :  { %v5477_v6 = vpop.f32.mrf.mxu1  ;;  %v5497_v7 = vpop.f32.mrf.mxu0 }
 0xf33   :  { %5498 = vmatprep.subr.mxu1 %v5497_v7  ;;  %5517 = vmatprep.subr.mxu0 %v5477_v6 }
 0xf34   :  { %v3132_v9 = vpop.f32.mrf.mxu1  ;;  %v3242_v11 = vpop.f32.mrf.mxu0  ;;  %5499 = vmatpush3.msra.mxu1 %v5497_v7  ;;  %5518 = vmatpush3.msra.mxu0 %v5477_v6 }
 0xf35   :  { %5500 = vmatprep.subr.mxu1 %v3242_v11  ;;  %5519 = vmatprep.subr.mxu0 %v3132_v9 }
 0xf36   :  { %5501 = vmatpush3.msra.mxu1 %v3242_v11  ;;  %5520 = vmatpush3.msra.mxu0 %v3132_v9 }
 0xf37   :  { %5502 = vmatprep.subr.mxu1 %v5494_v3  ;;  %5521 = vmatprep.subr.mxu0 %v5474_v2 }
 0xf38   :  { %5503 = vmatpush3.msra.mxu1 %v5494_v3  ;;  %5522 = vmatpush3.msra.mxu0 %v5474_v2 }
 0xf39   :  { %5504 = vmatprep.subr.mxu1 %v3232_v5  ;;  %5523 = vmatprep.subr.mxu0 %v3122_v4 }
 0xf3a   :  { %5505 = vmatpush3.msra.mxu1 %v3232_v5  ;;  %5524 = vmatpush3.msra.mxu0 %v3122_v4 }
 0xf3b   :  { %5506 = vmatprep.subr.mxu1 %v5491_v63  ;;  %5525 = vmatprep.subr.mxu0 %v5471_v62 }
 0xf3c   :  { %5507 = vmatpush3.msra.mxu1 %v5491_v63  ;;  %5526 = vmatpush3.msra.mxu0 %v5471_v62 }
 0xf3d   :  { %5508 = vmatprep.subr.mxu1 %v3222_v1  ;;  %5527 = vmatprep.subr.mxu0 %v3112_v0 }
 0xf3e   :  { %5509 = vmatpush3.msra.mxu1 %v3222_v1  ;;  %5528 = vmatpush3.msra.mxu0 %v3112_v0 }
 0xf3f   :  { %5510 = vmatprep.subr.mxu1 %v5488_v59  ;;  %5529 = vmatprep.subr.mxu0 %v5468_v58 }
 0xf40   :  { %5511 = vmatpush3.msra.mxu1 %v5488_v59  ;;  %5530 = vmatpush3.msra.mxu0 %v5468_v58 }
 0xf41   :  { %5512 = vmatprep.subr.mxu1 %v3212_v61  ;;  %5531 = vmatprep.subr.mxu0 %v3102_v60 }
 0xf42   :  { %5513 = vmatpush3.msra.mxu1 %v3212_v61  ;;  %5532 = vmatpush3.msra.mxu0 %v3102_v60  ;;  %v4591_v61 = vld [vmem:[%s6920_s14 + $0x1] ss:$0 sm:$0xff] }
 0xf43   :  { %5515 = vmatmul.mubr.msk.f32.vlgmr.msra.gmra.mxu1 %vm848_vm3, %v5772_v13  ;;  %5534 = vmatmul.mubr.msk.f32.vlgmr.msra.gmra.mxu0 %vm848_vm3, %v5773_v14 }
 0xf44   :  { %5536 = vmatprep.subr.mxu1 %v4565_v12  ;;  %5544 = vmatprep.mubr.msk.f32.mxu1 %vm331_vm2, %v6654_v48 }
 0xf45   :  { %5537 = vmatpush3.msra.mxu1 %v4565_v12  ;;  %5572 = vmatprep.mubr.msk.f32.mxu0 %vm848_vm3, %v5774_v17 }
 0xf46   :  { %5538 = vmatprep.subr.mxu1 %v4564_v15 }
 0xf47   :  { %5539 = vmatpush3.msra.mxu1 %v4564_v15 }
 0xf48   :  { %5540 = vmatprep.subr.mxu1 %v4563_v16 }
 0xf49   :  { %5541 = vmatpush3.msra.mxu1 %v4563_v16 }
 0xf4a   :  { %5542 = vmatprep.subr.mxu1 %v4562_v18 }
 0xf4b   :  { %5543 = vmatpush3.msra.mxu1 %v4562_v18 }
 0xf4c   :  { %5545 = vmatmul.mubr.msk.f32.vlgmr.msra.gmra.mxu1 %vm331_vm2, %v6652_v47  ;;  %5575 = vmatprep.subr.mxu1 %v4579_v19 }
 0xf4d   :  { %5547 = vmatprep.mubr.msk.f32.mxu1 %vm331_vm2, %v6666_v51  ;;  %5576 = vmatpush3.msra.mxu1 %v4579_v19 }
 0xf4e   :  { %5577 = vmatprep.subr.mxu1 %v4578_v20 }
 0xf4f   :  { %5578 = vmatpush3.msra.mxu1 %v4578_v20 }
 0xf50   :  { %5548 = vmatmul.mubr.msk.f32.gmra.mxu1 %vm331_vm2, %v6660_v50  ;;  %5579 = vmatprep.subr.mxu1 %v4577_v21 }
 0xf51   :  { %5550 = vmatprep.mubr.msk.f32.mxu1 %vm331_vm2, %v6678_v53  ;;  %5580 = vmatpush3.msra.mxu1 %v4577_v21 }
 0xf52   :  { %5581 = vmatprep.subr.mxu1 %v4576_v22 }
 0xf53   :  { %5582 = vmatpush3.msra.mxu1 %v4576_v22 }
 0xf54   :  { %5551 = vmatmul.mubr.msk.f32.gmra.mxu1 %vm331_vm2, %v6672_v52  ;;  %5614 = vmatprep.subr.mxu1 %v4598_v44 }
 0xf55   :  { %5553 = vmatprep.mubr.msk.f32.mxu1 %vm331_vm2, %v6690_v55 }
 0xf58   :  { %5554 = vmatmul.mubr.msk.f32.gmra.mxu1 %vm331_vm2, %v6684_v54 }
 0xf59   :  { %5583 = vmatprep.mubr.msk.f32.mxu1 %vm331_vm2, %v6654_v48  ;;  %v4610_v48 = vld [vmem:[%s6923_s17 + $0x78] sm:$0xff] }
 0xf5c   :  { %5584 = vmatmul.mubr.msk.f32.vlgmr.msra.gmra.mxu1 %vm331_vm2, %v6652_v47  ;;  %v4595_v47 = vld [vmem:[%s6921_s15 + $0x20] sm:$0xff] }
 0xf5d   :  { %5586 = vmatprep.mubr.msk.f32.mxu1 %vm331_vm2, %v6666_v51  ;;  %5615 = vmatpush3.msra.mxu1 %v4598_v44  ;;  %v4608_v51 = vld [vmem:[%s6923_s17 + $0x68] sm:$0xff]  ;;  %v4600_v44 = vld [vmem:[%s6922_s16 + $0x1] ss:$0 sm:$0xff] }
 0xf5e   :  { %5616 = vmatprep.subr.mxu1 %v4597_v45 }
 0xf5f   :  { %5617 = vmatpush3.msra.mxu1 %v4597_v45 }
 0xf60   :  { %5587 = vmatmul.mubr.msk.f32.gmra.mxu1 %vm331_vm2, %v6660_v50  ;;  %5618 = vmatprep.subr.mxu1 %v4596_v46  ;;  %v4609_v50 = vld [vmem:[%s6923_s17 + $0x70] sm:$0xff] }
 0xf61   :  { %5589 = vmatprep.mubr.msk.f32.mxu1 %vm331_vm2, %v6678_v53  ;;  %5619 = vmatpush3.msra.mxu1 %v4596_v46 }
 0xf62   :  { %5620 = vmatprep.subr.mxu1 %v4595_v47 }
 0xf63   :  { %5621 = vmatpush3.msra.mxu1 %v4595_v47 }
 0xf64   :  { %5590 = vmatmul.mubr.msk.f32.gmra.mxu1 %vm331_vm2, %v6672_v52  ;;  %v4607_v52 = vld [vmem:[%s6923_s17 + $0x60] sm:$0xff] }
 0xf65   :  { %5592 = vmatprep.mubr.msk.f32.mxu1 %vm331_vm2, %v6690_v55 }
 0xf68   :  { %5593 = vmatmul.mubr.msk.f32.gmra.mxu1 %vm331_vm2, %v6684_v54 }
0x1003   :  { %v6776_v23 = vpop.f32.mrf.mxu1  ;;  %v5535_v53 = vpop.f32.mrf.mxu0 }
0x1004   :  { %v3398_v56 = vadd.f32 %v5535_v53, %v6776_v23  ;;  %v4079_v53 = vld [vmem:[%s6929_s23 + $0x10] sm:$0xff] }
0x1005   :  { %v6778_v24 = vpop.f32.mrf.mxu1  ;;  %v3392_v54 = vpop.f32.mrf.mxu0 }
0x1006   :  { %v3393_v58 = vadd.f32 %v3392_v54, %v6778_v24  ;;  %v4078_v54 = vld [vmem:[%s6929_s23 + $0x8] sm:$0xff] }
0x100c   :  { %v5546_v25 = vpop.f32.mrf.mxu1 }
0x100e   :  { %v3472_v26 = vpop.f32.mrf.mxu1 }
0x1010   :  { %v5549_v27 = vpop.f32.mrf.mxu1 }
0x1012   :  { %v3482_v28 = vpop.f32.mrf.mxu1 }
0x1014   :  { %v5552_v29 = vpop.f32.mrf.mxu1 }
0x1016   :  { %v3492_v30 = vpop.f32.mrf.mxu1 }
0x1018   :  { %v5555_v31 = vpop.f32.mrf.mxu1 }
0x1019   :  { %5556 = vmatprep.subr.mxu0 %v5555_v31 }
0x101a   :  { %v3502_v32 = vpop.f32.mrf.mxu1  ;;  %5557 = vmatpush3.msra.mxu0 %v5555_v31  ;;  %v4592_v31 = vld [vmem:[%s6925_s19 + $0x1] sm:$0x1]  ;;  %s6960_s19 = sld [smem:[#allocation10_spill]] }
0x101b   :  { %5558 = vmatprep.subr.mxu0 %v3502_v32 }
0x101c   :  { %5559 = vmatpush3.msra.mxu0 %v3502_v32  ;;  %v5585_v33 = vpop.f32.mrf.mxu1 }
0x101d   :  { %5560 = vmatprep.subr.mxu0 %v5552_v29 }
0x101e   :  { %5561 = vmatpush3.msra.mxu0 %v5552_v29  ;;  %v3659_v34 = vpop.f32.mrf.mxu1 }
0x101f   :  { %5562 = vmatprep.subr.mxu0 %v3492_v30 }
0x1020   :  { %5563 = vmatpush3.msra.mxu0 %v3492_v30  ;;  %v5588_v35 = vpop.f32.mrf.mxu1 }
0x1021   :  { %5564 = vmatprep.subr.mxu0 %v5549_v27 }
0x1022   :  { %5565 = vmatpush3.msra.mxu0 %v5549_v27  ;;  %v3669_v36 = vpop.f32.mrf.mxu1 }
0x1023   :  { %5566 = vmatprep.subr.mxu0 %v3482_v28 }
0x1024   :  { %5567 = vmatpush3.msra.mxu0 %v3482_v28  ;;  %v5591_v37 = vpop.f32.mrf.mxu1 }
0x1025   :  { %5568 = vmatprep.subr.mxu0 %v5546_v25 }
0x1026   :  { %5569 = vmatpush3.msra.mxu0 %v5546_v25  ;;  %v3679_v38 = vpop.f32.mrf.mxu1 }
0x1027   :  { %5570 = vmatprep.subr.mxu0 %v3472_v26 }
0x1028   :  { %5571 = vmatpush3.msra.mxu0 %v3472_v26  ;;  %v5594_v39 = vpop.f32.mrf.mxu1 }
0x1029   :  { %5573 = vmatmul.mubr.msk.f32.vlgmr.msra.gmra.mxu0 %vm848_vm3, %v5775_v40  ;;  %5595 = vmatprep.subr.mxu0 %v5594_v39  ;;  %v4606_v40 = vld [vmem:[%s6923_s17 + $0x58] sm:$0xff] }
0x102a   :  { %v3689_v41 = vpop.f32.mrf.mxu1  ;;  %5596 = vmatpush3.msra.mxu0 %v5594_v39  ;;  %5611 = vmatprep.mubr.msk.f32.mxu0 %vm848_vm3, %v5776_v42  ;;  %v4604_v42 = vld [vmem:[%s6923_s17 + $0x48] sm:$0xff] }
0x102b   :  { %5597 = vmatprep.subr.mxu0 %v3689_v41 }
0x102c   :  { %5598 = vmatpush3.msra.mxu0 %v3689_v41  ;;  %v4605_v41 = vld [vmem:[%s6923_s17 + $0x50] sm:$0xff] }
0x102d   :  { %5599 = vmatprep.subr.mxu0 %v5591_v37 }
0x102e   :  { %5600 = vmatpush3.msra.mxu0 %v5591_v37 }
0x102f   :  { %5601 = vmatprep.subr.mxu0 %v3679_v38 }
0x1030   :  { %5602 = vmatpush3.msra.mxu0 %v3679_v38 }
0x1031   :  { %5603 = vmatprep.subr.mxu0 %v5588_v35 }
0x1032   :  { %5604 = vmatpush3.msra.mxu0 %v5588_v35  ;;  %v4594_v35 = vld [vmem:[%s6926_s20 + $0x1] ss:$0 sm:$0xff] }
0x1033   :  { %5605 = vmatprep.subr.mxu0 %v3669_v36 }
0x1034   :  { %5606 = vmatpush3.msra.mxu0 %v3669_v36 }
0x1035   :  { %5607 = vmatprep.subr.mxu0 %v5585_v33 }
0x1036   :  { %5608 = vmatpush3.msra.mxu0 %v5585_v33 }
0x1037   :  { %5609 = vmatprep.subr.mxu0 %v3659_v34 }
0x1038   :  { %5610 = vmatpush3.msra.mxu0 %v3659_v34 }
0x1039   :  { %5612 = vmatmul.mubr.msk.f32.vlgmr.msra.gmra.mxu0 %vm848_vm3, %v5777_v43  ;;  %5625 = vmatprep.subr.mxu0 %v4610_v48  ;;  %v4603_v43 = vld [vmem:[%s6923_s17 + $0x40] sm:$0xff]  ;;  %s5802_s17 = smov [#allocation2]  }
0x103a   :  { %5626 = vmatpush3.msra.mxu0 %v4610_v48  ;;  %s4332_s4 = sshll.u32 %s5802_s17, 4  ;;  %s4333_s4 = int_to_ptr.vmem [resolvable:$true] %s4332_s4 }
0x103b   :  { %5627 = vmatprep.subr.mxu0 %v4609_v50  ;;  %s5778_s16 = scalar_lea.vmem %s4333_s4, 32  ;;  %p5783_p1 = scmp.lt.s32.totalorder %s4333_s4, %s4333_s4 }
0x103c   :  { %5628 = vmatpush3.msra.mxu0 %v4609_v50  ;;  %p5779_p0 = scmp.ne.s32.totalorder %s4333_s4, %s5778_s16  ;;  %p5784_p2 = scmp.lt.s32.totalorder %s5778_s16, %s5778_s16 }
0x103d   :  { %5629 = vmatprep.subr.mxu0 %v4608_v51 }
0x103e   :  { %5630 = vmatpush3.msra.mxu0 %v4608_v51  ;;  %p5785_p3 = por %p5784_p2, %p5783_p1 }
0x103f   :  { %5631 = vmatprep.subr.mxu0 %v4607_v52 }
0x1040   :  { %5632 = vmatpush3.msra.mxu0 %v4607_v52  ;;  %v4080_v52 = vld [vmem:[%s6929_s23 + $0x18] sm:$0xff]  ;;  %p5786_p4 = pnand %p5785_p3, %p5779_p0 }
0x1041   :  { %5633 = vmatprep.subr.mxu0 %v4606_v40  ;;  %5644 = vmatprep.subr.mxu1 %v4080_v52 }
0x1042   :  { %5634 = vmatpush3.msra.mxu0 %v4606_v40 }
0x1043   :  { %5635 = vmatprep.subr.mxu0 %v4605_v41 }
0x1044   :  { %5636 = vmatpush3.msra.mxu0 %v4605_v41  ;;  %v4166_v41 = vld [vmem:[%s6961_s7] sm:$0x3] }
0x1045   :  { %5637 = vmatprep.subr.mxu0 %v4604_v42 }
0x1046   :  { %5638 = vmatpush3.msra.mxu0 %v4604_v42  ;;  %v4240_v42 = vld [vmem:[%s6959_s11] sm:$0xff] }
0x1047   :  { %5639 = vmatprep.subr.mxu0 %v4603_v43 }
0x1048   :  { %5640 = vmatpush3.msra.mxu0 %v4603_v43 }
0x10e9   :  { %v5574_v55 = vpop.f32.mrf.mxu0 }
0x10ea   :  { %v3587_v59 = vadd.f32 %v5574_v55, %v3398_v56  ;;  %v4077_v55 = vld [vmem:[%s6929_s23] sm:$0xff] }
0x10eb   :  { %v3577_v57 = vpop.f32.mrf.mxu0  ;;  %v4612_v56 = vld [vmem:[%s6958_s29 + $0x1] ss:$0 sm:$0xff] }
0x10ec   :  { %v3586_v62 = vadd.f32 %v3577_v57, %v3393_v58 }
0x10f9   :  { %v5613_v60 = vpop.f32.mrf.mxu0 }
0x10fa   :  { %v3774_v63 = vadd.f32 %v5613_v60, %v3587_v59 }
0x10fb   :  { %v3764_v0 = vpop.f32.mrf.mxu0 }
0x10fc   :  { %v3784_v1 = vadd.f32 %v4591_v61, %v3774_v63  ;;  %v3773_v2 = vadd.f32 %v3764_v0, %v3586_v62 }
0x10fe   :  { %v3786_v3 = vadd.f32 %v3784_v1, %v5955_v8  ;;  %v3783_v4 = vadd.f32 %v4591_v61, %v3773_v2 }
0x1100   :  { %v3785_v5 = vadd.f32 %v3783_v4, %v5957_v10  ;;  %v3792_v6 = vsel %vm331_vm2, %v3786_v3, 0.0 }
0x1102   :  { %v3791_v7 = vsel %vm331_vm2, %v3785_v5, 0.0 }
0x1103   :  { %v3793_v9 = vadd.f32 %v3792_v6, %v3791_v7 }
0x1105   :  { %v3794_v11 = vrot.slane %v3793_v9, 4 }
0x1107   :  { %v3795_v12 = vadd.f32 %v3794_v11, %v3793_v9 }
0x1109   :  { %v3796_v13 = vrot.slane %v3795_v12, 2 }
0x110b   :  { %v3797_v14 = vadd.f32 %v3796_v13, %v3795_v12 }
0x110d   :  { %v3798_v15 = vrot.slane %v3797_v14, 1 }
0x110f   :  { %v3799_v16 = vadd.f32 %v3798_v15, %v3797_v14 }
0x1111   :  { %v3800_v17 = vmul.f32 0.0625, %v3799_v16 }
0x1113   :  { %v3801_v18 = vsub.f32 %v3785_v5, %v3800_v17  ;;  %v3802_v19 = vsub.f32 %v3786_v3, %v3800_v17 }
0x1115   :  { %v3803_v20 = vmul.f32 %v3801_v18, %v3801_v18  ;;  %v3804_v21 = vmul.f32 %v3802_v19, %v3802_v19 }
0x1117   :  { %v3805_v8 = vsel %vm331_vm2, %v3803_v20, 0.0  ;;  %v3806_v10 = vsel %vm331_vm2, %v3804_v21, 0.0 }
0x1118   :  { %v3807_v22 = vadd.f32 %v3806_v10, %v3805_v8 }
0x111a   :  { %v3808_v23 = vrot.slane %v3807_v22, 4 }
0x111c   :  { %v3809_v24 = vadd.f32 %v3808_v23, %v3807_v22 }
0x111e   :  { %v3810_v25 = vrot.slane %v3809_v24, 2 }
0x1120   :  { %v3811_v26 = vadd.f32 %v3810_v25, %v3809_v24  ;;  %v4615_v24 = vld [vmem:[%s6927_s21 + $0x1] sm:$0x1] }
0x1122   :  { %v3812_v27 = vrot.slane %v3811_v26, 1 }
0x1124   :  { %v3813_v28 = vadd.f32 %v3812_v27, %v3811_v26 }
0x1126   :  { %v3814_v29 = vmul.f32 0.0625, %v3813_v28  ;;  %v4617_v28 = vld [vmem:[%s6928_s22 + $0x1] ss:$0 sm:$0xff] }
0x1128   :  { %v3815_v30 = vadd.f32 1e-05, %v3814_v29 }
0x112a   :  { %5742 = vrsqrt.f32 %v3815_v30 }
0x1137   :  { %v5743_v32 = vpop.eup %5742 }
0x1138   :  { %v3817_v33 = vmul.f32 %v5743_v32, %v4592_v31 }
0x113a   :  { %v3822_v34 = vrot.slane %v3817_v33, %v6367_v49  ;;  %v5800_v33 = vmov 0.0  }
0x113b   :  { %5662 = vmatprep.subr.mxu0 %v5800_v33 }
0x113c   :  { %v3824_v36 = vmul.f32 %v3822_v34, %v3801_v18  ;;  %v3825_v37 = vmul.f32 %v3822_v34, %v3802_v19  ;;  %v4241_v34 = vld [vmem:[%s6959_s11 + $0x8] sm:$0xff] }
0x113e   :  { %v3832_v38 = vadd.f32 %v4594_v35, %v3824_v36  ;;  %v3833_v39 = vadd.f32 %v4594_v35, %v3825_v37  ;;  %v4163_v35 = vld [vmem:[%s6960_s19 + $0x8] sm:$0xff]  ;;  %v4162_v37 = vld [vmem:[%s6960_s19] sm:$0xff] }
0x1140   :  { %5622 = vmatprep.mubr.msk.f32.mxu1 %vm331_vm2, %v3832_v38 }
0x1141   :  { %5623 = vmatmul.mubr.msk.f32.vlgmr.msra.gmra.mxu1 %vm331_vm2, %v3833_v39 }
0x1142   :  { %5645 = vmatpush3.msra.mxu1 %v4080_v52 }
0x1143   :  { %5646 = vmatprep.subr.mxu1 %v4079_v53 }
0x1144   :  { %5647 = vmatpush3.msra.mxu1 %v4079_v53 }
0x1145   :  { %5648 = vmatprep.subr.mxu1 %v4078_v54 }
0x1146   :  { %5649 = vmatpush3.msra.mxu1 %v4078_v54 }
0x1147   :  { %5650 = vmatprep.subr.mxu1 %v4077_v55 }
0x1148   :  { %5651 = vmatpush3.msra.mxu1 %v4077_v55 }
0x1149   :  { %5655 = vmatprep.subr.mxu1 %v5800_v33 }
0x1201   :  { %v5624_v45 = vpop.f32.mrf.mxu1 }
0x1202   :  { %v3925_v46 = vadd.f32 %v5624_v45, %v4600_v44  ;;  %v4621_v45 = vld [vmem:[%s6930_s24] ss:$0 sm:$0xff] }
0x1203   :  { %v3919_v47 = vpop.f32.mrf.mxu1 }
0x1204   :  { %v3920_v48 = vadd.f32 %v4600_v44, %v3919_v47  ;;  %v3929_v51 = vmax.f32 %v3925_v46, 0.0 }
0x1206   :  { %v3928_v50 = vmax.f32 %v3920_v48, 0.0 }
0x1208   :  { %5641 = vmatprep.mubr.msk.f32.mxu0 %vm848_vm3, %v3928_v50 }
0x1209   :  { %5642 = vmatmul.mubr.msk.f32.vlgmr.msra.gmra.mxu0 %vm848_vm3, %v3929_v51 }
0x120a   :  { %5668 = vmatprep.mubr.msk.f32.mxu0 %vm5801_vm4, %v5800_v33 }
0x12c9   :  { %v5643_v57 = vpop.f32.mrf.mxu0 }
0x12ca   :  { %v4025_v58 = vadd.f32 %v5643_v57, %v4612_v56 }
0x12cb   :  { %v4019_v59 = vpop.f32.mrf.mxu0 }
0x12cc   :  { %v4029_v60 = vadd.f32 %v4025_v58, %v3833_v39  ;;  %v4020_v61 = vadd.f32 %v4612_v56, %v4019_v59 }
0x12ce   :  { %v4028_v62 = vadd.f32 %v4020_v61, %v3832_v38  ;;  %v4035_v63 = vsel %vm331_vm2, %v4029_v60, 0.0 }
0x12d0   :  { %v4034_v0 = vsel %vm331_vm2, %v4028_v62, 0.0 }
0x12d1   :  { %v4036_v1 = vadd.f32 %v4035_v63, %v4034_v0 }
0x12d3   :  { %v4037_v2 = vrot.slane %v4036_v1, 4 }
0x12d5   :  { %v4038_v3 = vadd.f32 %v4037_v2, %v4036_v1 }
0x12d7   :  { %v4039_v4 = vrot.slane %v4038_v3, 2 }
0x12d9   :  { %v4040_v5 = vadd.f32 %v4039_v4, %v4038_v3 }
0x12db   :  { %v4041_v6 = vrot.slane %v4040_v5, 1 }
0x12dd   :  { %v4042_v7 = vadd.f32 %v4041_v6, %v4040_v5 }
0x12df   :  { %v4043_v9 = vmul.f32 0.0625, %v4042_v7 }
0x12e1   :  { %v4044_v11 = vsub.f32 %v4028_v62, %v4043_v9  ;;  %v4045_v12 = vsub.f32 %v4029_v60, %v4043_v9 }
0x12e3   :  { %v4046_v13 = vmul.f32 %v4044_v11, %v4044_v11  ;;  %v4047_v14 = vmul.f32 %v4045_v12, %v4045_v12 }
0x12e5   :  { %v4048_v15 = vsel %vm331_vm2, %v4046_v13, 0.0  ;;  %v4049_v16 = vsel %vm331_vm2, %v4047_v14, 0.0 }
0x12e6   :  { %v4050_v17 = vadd.f32 %v4049_v16, %v4048_v15 }
0x12e8   :  { %v4051_v18 = vrot.slane %v4050_v17, 4 }
0x12ea   :  { %v4052_v19 = vadd.f32 %v4051_v18, %v4050_v17 }
0x12ec   :  { %v4053_v20 = vrot.slane %v4052_v19, 2 }
0x12ee   :  { %v4054_v21 = vadd.f32 %v4053_v20, %v4052_v19 }
0x12f0   :  { %v4055_v8 = vrot.slane %v4054_v21, 1 }
0x12f2   :  { %v4056_v10 = vadd.f32 %v4055_v8, %v4054_v21 }
0x12f4   :  { %v4057_v22 = vmul.f32 0.0625, %v4056_v10 }
0x12f6   :  { %v4058_v23 = vadd.f32 1e-05, %v4057_v22 }
0x12f8   :  { %5744 = vrsqrt.f32 %v4058_v23 }
0x1305   :  { %v5745_v25 = vpop.eup %5744 }
0x1306   :  { %v4060_v26 = vmul.f32 %v5745_v25, %v4615_v24 }
0x1308   :  { %v4065_v27 = vrot.slane %v4060_v26, %v6367_v49  ;;  %v4242_v49 = vld [vmem:[%s6959_s11 + $0x10] sm:$0xff] }
0x1309   :  { %5663 = vmatpush3.msra.mxu0 %v4242_v49 }
0x130a   :  { %v4067_v29 = vmul.f32 %v4065_v27, %v4044_v11  ;;  %v4068_v30 = vmul.f32 %v4065_v27, %v4045_v12  ;;  %5664 = vmatprep.subr.mxu0 %v5800_v33 }
0x130b   :  { %5665 = vmatpush3.msra.mxu0 %v4241_v34 }
0x130c   :  { %v4075_v31 = vadd.f32 %v4617_v28, %v4067_v29  ;;  %v4076_v32 = vadd.f32 %v4617_v28, %v4068_v30  ;;  %5666 = vmatprep.subr.mxu0 %v5800_v33 }
0x130d   :  { %5667 = vmatpush3.msra.mxu0 %v4240_v42 }
0x130e   :  { %5652 = vmatprep.mubr.msk.f32.mxu1 %vm331_vm2, %v4075_v31 }
0x130f   :  { %5653 = vmatmul.mubr.msk.f32.vlgmr.msra.gmra.mxu1 %vm331_vm2, %v4076_v32 }
0x1310   :  { %5659 = vmatprep.mubr.msk.f32.mxu1 %vm5801_vm4, %v5800_v33 }
0x13cf   :  { %v5654_v36 = vpop.f32.mrf.mxu1 }
0x13d0   :  { %v4165_v38 = vmul.f32 %v5654_v36, %v4163_v35 }
0x13d1   :  { %v4153_v39 = vpop.f32.mrf.mxu1 }
0x13d2   :  { %v4164_v40 = vmul.f32 %v4162_v37, %v4153_v39  ;;  %5656 = vmatpush3.msra.mxu1 %v4165_v38 }
0x13d3   :  { %5657 = vmatprep.subr.mxu1 %v5800_v33 }
0x13d4   :  { %5658 = vmatpush3.msra.mxu1 %v4164_v40 }
0x13d5   :  { %5660 = vmatmul.mubr.msk.f32.vlgmr.msra.gmra.mxu1 %vm197_vm1, %v4166_v41 }
0x1495   :  { %v4236_v43 = vpop.f32.mrf.mxu1 }
0x1496   :  { %5669 = vmatmul.mubr.msk.f32.vlgmr.msra.gmra.mxu0 %vm4250_vm5, %v4236_v43 }
0x1497   :  { %v5661_v44 = vpop.f32.mrf.mxu1 }
0x1556   :  { %v4320_v46 = vpop.f32.mrf.mxu0 }
0x1557   :  { %v4321_v47 = vadd.f32 %v4621_v45, %v4320_v46 }
0x1558   :  { %v5670_v48 = vpop.f32.mrf.mxu0 }
0x1559   :  { %4325 = vst.msk [vmem:[#allocation2] sm:$0x3] %vm4324_vm6, %v4321_v47 }
0x155a   :  { %5789 = shalt.err (!%p5786_p4)
}
0x155b   :  { %4335 = dma.vmem_to_hbm [thread:$0]  %s4333_s4, 32, %s6931_s25, [#allocation3]  }
0x155c   :  { %5798 = dma.done.wait [#allocation3], 32  }
0x155d   :  { %5799 = vsyncadd [#allocation3], 4294967264 }
0x155e   :  { %4339 = vsyncpa [#allocation3], 1 }

</bundles_post_ra>
